<compile_context>
chip_gen: v7x
topology: tpu7x:2x2x1
jax: 0.10.0
libtpu: 0.0.40
codegen_flags: <defaults>
</compile_context>

<pallas_src>
import functools

import jax
import jax.numpy as jnp
from jax.experimental import pallas as pl
from jax.experimental.pallas import tpu as pltpu


# ----------------------------------------------------------------------------
# Pallas kernel: fused (patches @ weight) + bias, optional LeakyReLU(0.2).
# ----------------------------------------------------------------------------
def _conv_mm_kernel(a_ref, w_ref, b_ref, o_ref, *, apply_act):
    # a_ref: (tm, K) bf16   w_ref: (K, OCp) bf16   b_ref: (1, OCp) f32
    acc = jnp.dot(a_ref[...], w_ref[...], preferred_element_type=jnp.float32)
    y = acc + b_ref[...]
    if apply_act:
        y = jnp.where(y > 0, y, 0.2 * y)  # LeakyReLU(0.2)
    o_ref[...] = y.astype(o_ref.dtype)


def _pick_tm(M):
    """Row tile: big for pipelining, but keep >=2 grid steps when possible
    (v7x has 2 TensorCores sharded over 'parallel' axes) and never a tile
    that is mostly padding for the tiny deep layers."""
    for tm in (512, 256, 128, 64, 32, 16):
        if M >= 2 * tm:
            return tm
    return min(M, 16)


def _fused_conv_matmul(patches, weight_km, bias, apply_act, out_dtype, tm):
    """patches: [M, K] bf16, weight_km: [K, OCp] bf16, bias: [OCp] f32."""
    M, K = patches.shape
    OCp = weight_km.shape[1]
    bias2 = bias.reshape(1, OCp).astype(jnp.float32)

    kernel = functools.partial(_conv_mm_kernel, apply_act=apply_act)

    return pl.pallas_call(
        kernel,
        out_shape=jax.ShapeDtypeStruct((M, OCp), out_dtype),
        grid_spec=pltpu.PrefetchScalarGridSpec(
            num_scalar_prefetch=0,
            grid=(pl.cdiv(M, tm),),          # ragged last block is fine
            in_specs=[
                pl.BlockSpec((tm, K), lambda i: (i, 0)),
                pl.BlockSpec((K, OCp), lambda i: (0, 0)),
                pl.BlockSpec((1, OCp), lambda i: (0, 0)),
            ],
            out_specs=pl.BlockSpec((tm, OCp), lambda i: (i, 0)),
        ),
        compiler_params=pltpu.CompilerParams(
            dimension_semantics=("parallel",)),
    )(patches, weight_km, bias2)


# ----------------------------------------------------------------------------
# im2col glue (plain JAX): NHWC -> [N*OH*OW, KH*KW*C]  (K-order = (KH, KW, C),
# so only the tiny weight needs a transpose, never the big patch tensor).
# ----------------------------------------------------------------------------
def _im2col(x_nhwc, kh, kw, stride, pad):
    N, H, W, C = x_nhwc.shape
    xp = jnp.pad(x_nhwc, ((0, 0), (pad, pad), (pad, pad), (0, 0)))
    OH = (H + 2 * pad - kh) // stride + 1
    OW = (W + 2 * pad - kw) // stride + 1
    cols = []
    for i in range(kh):
        for j in range(kw):
            cols.append(
                xp[:, i:i + OH * stride:stride, j:j + OW * stride:stride, :])
    patches = jnp.stack(cols, axis=3).reshape(N * OH * OW, kh * kw * C)
    return patches, OH, OW


def _round_up(n, m):
    return ((n + m - 1) // m) * m


def _conv_layer(x_nhwc, weight_ockhw, scale, bias, stride, pad, apply_act,
                out_dtype):
    """One conv(+folded BN)(+LeakyReLU) layer.

    weight is PyTorch [OC, C, KH, KW].  x_nhwc may carry zero-padded channels
    from the previous layer; only the first C (real) channels are used.
    Returns (y_nhwc with OC padded to a multiple of 128, real OC).
    """
    OC, C, KH, KW = weight_ockhw.shape
    N = x_nhwc.shape[0]

    x = x_nhwc[..., :C].astype(jnp.bfloat16)
    patches, OH, OW = _im2col(x, KH, KW, stride, pad)

    # Weight: [OC, C, KH, KW] -> [KH, KW, C, OC] -> [K, OC], BN scale folded.
    w_km = jnp.transpose(weight_ockhw, (2, 3, 1, 0)).reshape(KH * KW * C, OC)
    w_km = w_km * scale.astype(jnp.float32)[None, :]

    # Lane-dense output: pad OC to a multiple of 128 with zero columns/bias,
    # so padded output channels are exactly zero (LeakyReLU(0) == 0).
    OCp = max(128, _round_up(OC, 128))
    bias = bias.astype(jnp.float32)
    if OCp != OC:
        w_km = jnp.pad(w_km, ((0, 0), (0, OCp - OC)))
        bias = jnp.pad(bias, (0, OCp - OC))

    tm = _pick_tm(N * OH * OW)
    out = _fused_conv_matmul(patches, w_km.astype(jnp.bfloat16), bias,
                             apply_act, out_dtype, tm)
    return out.reshape(N, OH, OW, OCp), OC


# ----------------------------------------------------------------------------
# Parameter construction (deterministic, DCGAN-style init).
# ----------------------------------------------------------------------------
def make_params(key, nc, ndf, n_classes):
    ks = jax.random.split(key, 16)
    p = {}
    p["w1"] = 0.02 * jax.random.normal(ks[0], (ndf, nc, 4, 4), jnp.float32)
    p["w2"] = 0.02 * jax.random.normal(ks[1], (ndf * 2, ndf, 4, 4), jnp.float32)
    p["w3"] = 0.02 * jax.random.normal(ks[2], (ndf * 4, ndf * 2, 4, 4), jnp.float32)
    p["w4"] = 0.02 * jax.random.normal(ks[3], (ndf * 8, ndf * 4, 4, 4), jnp.float32)
    p["w5"] = 0.02 * jax.random.normal(
        ks[4], (n_classes + 1, ndf * 8, 4, 4), jnp.float32)

    def bn_params(kg, kb, km, kv, c):
        gamma = 1.0 + 0.02 * jax.random.normal(kg, (c,), jnp.float32)
        beta = 0.02 * jax.random.normal(kb, (c,), jnp.float32)
        rmean = 0.1 * jax.random.normal(km, (c,), jnp.float32)
        rvar = 1.0 + 0.1 * jnp.abs(jax.random.normal(kv, (c,), jnp.float32))
        eps = 1e-5
        scale = gamma / jnp.sqrt(rvar + eps)
        bias = beta - rmean * scale
        return scale, bias

    p["s2"], p["b2"] = bn_params(ks[5], ks[6], ks[7], ks[8], ndf * 2)
    p["s3"], p["b3"] = bn_params(ks[9], ks[10], ks[11], ks[12], ndf * 4)
    p["s4"], p["b4"] = bn_params(ks[13], ks[14], ks[15], ks[5], ndf * 8)
    return p


# ----------------------------------------------------------------------------
# Forward pass (mirrors _netD_DCGAN.forward). Input: NCHW, like PyTorch.
# ----------------------------------------------------------------------------
def netD_forward(params, x_nchw, ndf, n_classes):
    x = jnp.transpose(x_nchw, (0, 2, 3, 1))  # NCHW -> NHWC

    one = lambda c: jnp.ones((c,), jnp.float32)
    zero = lambda c: jnp.zeros((c,), jnp.float32)
    bf16 = jnp.bfloat16

    # conv1 + LeakyReLU (no BN)
    x, _ = _conv_layer(x, params["w1"], one(ndf), zero(ndf),
                       stride=2, pad=1, apply_act=True, out_dtype=bf16)
    # conv2 + BN2 + LeakyReLU
    x, _ = _conv_layer(x, params["w2"], params["s2"], params["b2"],
                       stride=2, pad=1, apply_act=True, out_dtype=bf16)
    # conv3 + BN3 + LeakyReLU
    x, _ = _conv_layer(x, params["w3"], params["s3"], params["b3"],
                       stride=2, pad=1, apply_act=True, out_dtype=bf16)
    # conv4 + BN4 + LeakyReLU
    x, _ = _conv_layer(x, params["w4"], params["s4"], params["b4"],
                       stride=2, pad=1, apply_act=True, out_dtype=bf16)
    # final_conv (4x4, stride 1, pad 0, no BN, no activation) -> f32 logits
    nc_out = n_classes + 1
    x, oc = _conv_layer(x, params["w5"], one(nc_out), zero(nc_out),
                        stride=1, pad=0, apply_act=False,
                        out_dtype=jnp.float32)
    x = x[..., :oc]                          # drop lane-padding channels
    return jnp.transpose(x, (0, 3, 1, 2))    # NHWC -> NCHW


if __name__ == "__main__":
    # Small but shape-consistent config: four stride-2 4x4 convs followed by a
    # 4x4 valid conv require 64x64 spatial input (64->32->16->8->4->1).
    N, nc, ndf, n_classes = 2, 3, 8, 10
    H = W = 64

    key = jax.random.PRNGKey(0)
    k_x, k_p = jax.random.split(key)
    x = jax.random.normal(k_x, (N, nc, H, W), jnp.float32)
    params = make_params(k_p, nc, ndf, n_classes)

    fwd = jax.jit(functools.partial(netD_forward, ndf=ndf, n_classes=n_classes))
    out = fwd(params, x)
    out = jax.block_until_ready(out)

    assert out.shape == (N, n_classes + 1, 1, 1), out.shape
    assert bool(jnp.all(jnp.isfinite(out)))
    print("KERNEL_OK")
</pallas_src>

<mosaic_0001>
module attributes {stable_mosaic.version = 11 : i64} {
  func.func @_conv_mm_kernel(%arg0: i32, %arg1: memref<512x48xbf16, #tpu.memory_space<vmem>>, %arg2: memref<48x128xbf16, #tpu.memory_space<vmem>>, %arg3: memref<1x128xf32, #tpu.memory_space<vmem>>, %arg4: memref<512x128xbf16, #tpu.memory_space<vmem>>) attributes {dimension_semantics = [#tpu.dimension_semantics<parallel>], iteration_bounds = array<i64: 4>, scalar_prefetch = 0 : i64, scratch_operands = 0 : i64, tpu.core_type = #tpu.core_type<tc>, window_params = [{transform_indices = @transform_0, window_bounds = array<i64: 512, 48>}, {pipeline_mode = #tpu.pipeline_mode<synchronous>, transform_indices = @transform_1, window_bounds = array<i64: 48, 128>}, {pipeline_mode = #tpu.pipeline_mode<synchronous>, transform_indices = @transform_2, window_bounds = array<i64: 1, 128>}, {transform_indices = @transform_3, window_bounds = array<i64: 512, 128>}]} {
    %c0 = arith.constant 0 : index
    %c0_0 = arith.constant 0 : index
    %0 = vector.load %arg1[%c0, %c0_0] : memref<512x48xbf16, #tpu.memory_space<vmem>>, vector<512x48xbf16>
    %c0_1 = arith.constant 0 : index
    %c0_2 = arith.constant 0 : index
    %1 = vector.load %arg2[%c0_1, %c0_2] : memref<48x128xbf16, #tpu.memory_space<vmem>>, vector<48x128xbf16>
    %cst = arith.constant dense<0.000000e+00> : vector<512x128xf32>
    %2 = tpu.matmul %0, %1, %cst {dimension_numbers = #tpu.dot_dimension_numbers<[1], [0], [0], [1], [0, 0, 1, 1], [], []>} : vector<512x48xbf16>, vector<48x128xbf16>, vector<512x128xf32> -> vector<512x128xf32>
    %c0_3 = arith.constant 0 : index
    %c0_4 = arith.constant 0 : index
    %3 = vector.load %arg3[%c0_3, %c0_4] : memref<1x128xf32, #tpu.memory_space<vmem>>, vector<1x128xf32>
    %4 = vector.broadcast %3 : vector<1x128xf32> to vector<512x128xf32>
    %5 = arith.addf %2, %4 : vector<512x128xf32>
    %cst_5 = arith.constant 0.000000e+00 : f32
    %6 = vector.broadcast %cst_5 : f32 to vector<512x128xf32>
    %7 = arith.cmpf ogt, %5, %6 : vector<512x128xf32>
    %cst_6 = arith.constant 2.000000e-01 : f32
    %8 = vector.broadcast %cst_6 : f32 to vector<512x128xf32>
    %9 = arith.mulf %8, %5 : vector<512x128xf32>
    %10 = arith.select %7, %5, %9 : vector<512x128xi1>, vector<512x128xf32>
    %11 = arith.truncf %10 : vector<512x128xf32> to vector<512x128xbf16>
    %c0_7 = arith.constant 0 : index
    %c0_8 = arith.constant 0 : index
    %12 = vector.load %arg4[%c0_7, %c0_8] : memref<512x128xbf16, #tpu.memory_space<vmem>>, vector<512x128xbf16>
    tpu.vector_store %arg4[%c0_7, %c0_8], %11 {strides = array<i32>} : memref<512x128xbf16, #tpu.memory_space<vmem>>, vector<512x128xbf16>,
    return
  }
  func.func @transform_0(%arg0: i32) -> (i32, i32) {
    %c0_i32 = arith.constant 0 : i32
    %c0_i32_0 = arith.constant 0 : i32
    return %arg0, %c0_i32 : i32, i32
  }
  func.func @transform_1(%arg0: i32) -> (i32, i32) {
    %c0_i32 = arith.constant 0 : i32
    %c0_i32_0 = arith.constant 0 : i32
    %c0_i32_1 = arith.constant 0 : i32
    return %c0_i32, %c0_i32_0 : i32, i32
  }
  func.func @transform_2(%arg0: i32) -> (i32, i32) {
    %c0_i32 = arith.constant 0 : i32
    %c0_i32_0 = arith.constant 0 : i32
    %c0_i32_1 = arith.constant 0 : i32
    return %c0_i32, %c0_i32_0 : i32, i32
  }
  func.func @transform_3(%arg0: i32) -> (i32, i32) {
    %c0_i32 = arith.constant 0 : i32
    %c0_i32_0 = arith.constant 0 : i32
    return %arg0, %c0_i32 : i32, i32
  }
}

module attributes {stable_mosaic.version = 11 : i64} {
  func.func @_conv_mm_kernel(%arg0: i32, %arg1: memref<256x128xbf16, #tpu.memory_space<vmem>>, %arg2: memref<128x128xbf16, #tpu.memory_space<vmem>>, %arg3: memref<1x128xf32, #tpu.memory_space<vmem>>, %arg4: memref<256x128xbf16, #tpu.memory_space<vmem>>) attributes {dimension_semantics = [#tpu.dimension_semantics<parallel>], iteration_bounds = array<i64: 2>, scalar_prefetch = 0 : i64, scratch_operands = 0 : i64, tpu.core_type = #tpu.core_type<tc>, window_params = [{transform_indices = @transform_0, window_bounds = array<i64: 256, 128>}, {pipeline_mode = #tpu.pipeline_mode<synchronous>, transform_indices = @transform_1, window_bounds = array<i64: 128, 128>}, {pipeline_mode = #tpu.pipeline_mode<synchronous>, transform_indices = @transform_2, window_bounds = array<i64: 1, 128>}, {transform_indices = @transform_3, window_bounds = array<i64: 256, 128>}]} {
    %c0 = arith.constant 0 : index
    %c0_0 = arith.constant 0 : index
    %0 = vector.load %arg1[%c0, %c0_0] : memref<256x128xbf16, #tpu.memory_space<vmem>>, vector<256x128xbf16>
    %c0_1 = arith.constant 0 : index
    %c0_2 = arith.constant 0 : index
    %1 = vector.load %arg2[%c0_1, %c0_2] : memref<128x128xbf16, #tpu.memory_space<vmem>>, vector<128x128xbf16>
    %cst = arith.constant dense<0.000000e+00> : vector<256x128xf32>
    %2 = tpu.matmul %0, %1, %cst {dimension_numbers = #tpu.dot_dimension_numbers<[1], [0], [0], [1], [0, 0, 1, 1], [], []>} : vector<256x128xbf16>, vector<128x128xbf16>, vector<256x128xf32> -> vector<256x128xf32>
    %c0_3 = arith.constant 0 : index
    %c0_4 = arith.constant 0 : index
    %3 = vector.load %arg3[%c0_3, %c0_4] : memref<1x128xf32, #tpu.memory_space<vmem>>, vector<1x128xf32>
    %4 = vector.broadcast %3 : vector<1x128xf32> to vector<256x128xf32>
    %5 = arith.addf %2, %4 : vector<256x128xf32>
    %cst_5 = arith.constant 0.000000e+00 : f32
    %6 = vector.broadcast %cst_5 : f32 to vector<256x128xf32>
    %7 = arith.cmpf ogt, %5, %6 : vector<256x128xf32>
    %cst_6 = arith.constant 2.000000e-01 : f32
    %8 = vector.broadcast %cst_6 : f32 to vector<256x128xf32>
    %9 = arith.mulf %8, %5 : vector<256x128xf32>
    %10 = arith.select %7, %5, %9 : vector<256x128xi1>, vector<256x128xf32>
    %11 = arith.truncf %10 : vector<256x128xf32> to vector<256x128xbf16>
    %c0_7 = arith.constant 0 : index
    %c0_8 = arith.constant 0 : index
    %12 = vector.load %arg4[%c0_7, %c0_8] : memref<256x128xbf16, #tpu.memory_space<vmem>>, vector<256x128xbf16>
    tpu.vector_store %arg4[%c0_7, %c0_8], %11 {strides = array<i32>} : memref<256x128xbf16, #tpu.memory_space<vmem>>, vector<256x128xbf16>,
    return
  }
  func.func @transform_0(%arg0: i32) -> (i32, i32) {
    %c0_i32 = arith.constant 0 : i32
    %c0_i32_0 = arith.constant 0 : i32
    return %arg0, %c0_i32 : i32, i32
  }
  func.func @transform_1(%arg0: i32) -> (i32, i32) {
    %c0_i32 = arith.constant 0 : i32
    %c0_i32_0 = arith.constant 0 : i32
    %c0_i32_1 = arith.constant 0 : i32
    return %c0_i32, %c0_i32_0 : i32, i32
  }
  func.func @transform_2(%arg0: i32) -> (i32, i32) {
    %c0_i32 = arith.constant 0 : i32
    %c0_i32_0 = arith.constant 0 : i32
    %c0_i32_1 = arith.constant 0 : i32
    return %c0_i32, %c0_i32_0 : i32, i32
  }
  func.func @transform_3(%arg0: i32) -> (i32, i32) {
    %c0_i32 = arith.constant 0 : i32
    %c0_i32_0 = arith.constant 0 : i32
    return %arg0, %c0_i32 : i32, i32
  }
}

module attributes {stable_mosaic.version = 11 : i64} {
  func.func @_conv_mm_kernel(%arg0: i32, %arg1: memref<64x256xbf16, #tpu.memory_space<vmem>>, %arg2: memref<256x128xbf16, #tpu.memory_space<vmem>>, %arg3: memref<1x128xf32, #tpu.memory_space<vmem>>, %arg4: memref<64x128xbf16, #tpu.memory_space<vmem>>) attributes {dimension_semantics = [#tpu.dimension_semantics<parallel>], iteration_bounds = array<i64: 2>, scalar_prefetch = 0 : i64, scratch_operands = 0 : i64, tpu.core_type = #tpu.core_type<tc>, window_params = [{transform_indices = @transform_0, window_bounds = array<i64: 64, 256>}, {pipeline_mode = #tpu.pipeline_mode<synchronous>, transform_indices = @transform_1, window_bounds = array<i64: 256, 128>}, {pipeline_mode = #tpu.pipeline_mode<synchronous>, transform_indices = @transform_2, window_bounds = array<i64: 1, 128>}, {transform_indices = @transform_3, window_bounds = array<i64: 64, 128>}]} {
    %c0 = arith.constant 0 : index
    %c0_0 = arith.constant 0 : index
    %0 = vector.load %arg1[%c0, %c0_0] : memref<64x256xbf16, #tpu.memory_space<vmem>>, vector<64x256xbf16>
    %c0_1 = arith.constant 0 : index
    %c0_2 = arith.constant 0 : index
    %1 = vector.load %arg2[%c0_1, %c0_2] : memref<256x128xbf16, #tpu.memory_space<vmem>>, vector<256x128xbf16>
    %cst = arith.constant dense<0.000000e+00> : vector<64x128xf32>
    %2 = tpu.matmul %0, %1, %cst {dimension_numbers = #tpu.dot_dimension_numbers<[1], [0], [0], [1], [0, 0, 1, 1], [], []>} : vector<64x256xbf16>, vector<256x128xbf16>, vector<64x128xf32> -> vector<64x128xf32>
    %c0_3 = arith.constant 0 : index
    %c0_4 = arith.constant 0 : index
    %3 = vector.load %arg3[%c0_3, %c0_4] : memref<1x128xf32, #tpu.memory_space<vmem>>, vector<1x128xf32>
    %4 = vector.broadcast %3 : vector<1x128xf32> to vector<64x128xf32>
    %5 = arith.addf %2, %4 : vector<64x128xf32>
    %cst_5 = arith.constant 0.000000e+00 : f32
    %6 = vector.broadcast %cst_5 : f32 to vector<64x128xf32>
    %7 = arith.cmpf ogt, %5, %6 : vector<64x128xf32>
    %cst_6 = arith.constant 2.000000e-01 : f32
    %8 = vector.broadcast %cst_6 : f32 to vector<64x128xf32>
    %9 = arith.mulf %8, %5 : vector<64x128xf32>
    %10 = arith.select %7, %5, %9 : vector<64x128xi1>, vector<64x128xf32>
    %11 = arith.truncf %10 : vector<64x128xf32> to vector<64x128xbf16>
    %c0_7 = arith.constant 0 : index
    %c0_8 = arith.constant 0 : index
    %12 = vector.load %arg4[%c0_7, %c0_8] : memref<64x128xbf16, #tpu.memory_space<vmem>>, vector<64x128xbf16>
    tpu.vector_store %arg4[%c0_7, %c0_8], %11 {strides = array<i32>} : memref<64x128xbf16, #tpu.memory_space<vmem>>, vector<64x128xbf16>,
    return
  }
  func.func @transform_0(%arg0: i32) -> (i32, i32) {
    %c0_i32 = arith.constant 0 : i32
    %c0_i32_0 = arith.constant 0 : i32
    return %arg0, %c0_i32 : i32, i32
  }
  func.func @transform_1(%arg0: i32) -> (i32, i32) {
    %c0_i32 = arith.constant 0 : i32
    %c0_i32_0 = arith.constant 0 : i32
    %c0_i32_1 = arith.constant 0 : i32
    return %c0_i32, %c0_i32_0 : i32, i32
  }
  func.func @transform_2(%arg0: i32) -> (i32, i32) {
    %c0_i32 = arith.constant 0 : i32
    %c0_i32_0 = arith.constant 0 : i32
    %c0_i32_1 = arith.constant 0 : i32
    return %c0_i32, %c0_i32_0 : i32, i32
  }
  func.func @transform_3(%arg0: i32) -> (i32, i32) {
    %c0_i32 = arith.constant 0 : i32
    %c0_i32_0 = arith.constant 0 : i32
    return %arg0, %c0_i32 : i32, i32
  }
}

module attributes {stable_mosaic.version = 11 : i64} {
  func.func @_conv_mm_kernel(%arg0: i32, %arg1: memref<16x512xbf16, #tpu.memory_space<vmem>>, %arg2: memref<512x128xbf16, #tpu.memory_space<vmem>>, %arg3: memref<1x128xf32, #tpu.memory_space<vmem>>, %arg4: memref<16x128xbf16, #tpu.memory_space<vmem>>) attributes {dimension_semantics = [#tpu.dimension_semantics<parallel>], iteration_bounds = array<i64: 2>, scalar_prefetch = 0 : i64, scratch_operands = 0 : i64, tpu.core_type = #tpu.core_type<tc>, window_params = [{transform_indices = @transform_0, window_bounds = array<i64: 16, 512>}, {pipeline_mode = #tpu.pipeline_mode<synchronous>, transform_indices = @transform_1, window_bounds = array<i64: 512, 128>}, {pipeline_mode = #tpu.pipeline_mode<synchronous>, transform_indices = @transform_2, window_bounds = array<i64: 1, 128>}, {transform_indices = @transform_3, window_bounds = array<i64: 16, 128>}]} {
    %c0 = arith.constant 0 : index
    %c0_0 = arith.constant 0 : index
    %0 = vector.load %arg1[%c0, %c0_0] : memref<16x512xbf16, #tpu.memory_space<vmem>>, vector<16x512xbf16>
    %c0_1 = arith.constant 0 : index
    %c0_2 = arith.constant 0 : index
    %1 = vector.load %arg2[%c0_1, %c0_2] : memref<512x128xbf16, #tpu.memory_space<vmem>>, vector<512x128xbf16>
    %cst = arith.constant dense<0.000000e+00> : vector<16x128xf32>
    %2 = tpu.matmul %0, %1, %cst {dimension_numbers = #tpu.dot_dimension_numbers<[1], [0], [0], [1], [0, 0, 1, 1], [], []>} : vector<16x512xbf16>, vector<512x128xbf16>, vector<16x128xf32> -> vector<16x128xf32>
    %c0_3 = arith.constant 0 : index
    %c0_4 = arith.constant 0 : index
    %3 = vector.load %arg3[%c0_3, %c0_4] : memref<1x128xf32, #tpu.memory_space<vmem>>, vector<1x128xf32>
    %4 = vector.broadcast %3 : vector<1x128xf32> to vector<16x128xf32>
    %5 = arith.addf %2, %4 : vector<16x128xf32>
    %cst_5 = arith.constant 0.000000e+00 : f32
    %6 = vector.broadcast %cst_5 : f32 to vector<16x128xf32>
    %7 = arith.cmpf ogt, %5, %6 : vector<16x128xf32>
    %cst_6 = arith.constant 2.000000e-01 : f32
    %8 = vector.broadcast %cst_6 : f32 to vector<16x128xf32>
    %9 = arith.mulf %8, %5 : vector<16x128xf32>
    %10 = arith.select %7, %5, %9 : vector<16x128xi1>, vector<16x128xf32>
    %11 = arith.truncf %10 : vector<16x128xf32> to vector<16x128xbf16>
    %c0_7 = arith.constant 0 : index
    %c0_8 = arith.constant 0 : index
    %12 = vector.load %arg4[%c0_7, %c0_8] : memref<16x128xbf16, #tpu.memory_space<vmem>>, vector<16x128xbf16>
    tpu.vector_store %arg4[%c0_7, %c0_8], %11 {strides = array<i32>} : memref<16x128xbf16, #tpu.memory_space<vmem>>, vector<16x128xbf16>,
    return
  }
  func.func @transform_0(%arg0: i32) -> (i32, i32) {
    %c0_i32 = arith.constant 0 : i32
    %c0_i32_0 = arith.constant 0 : i32
    return %arg0, %c0_i32 : i32, i32
  }
  func.func @transform_1(%arg0: i32) -> (i32, i32) {
    %c0_i32 = arith.constant 0 : i32
    %c0_i32_0 = arith.constant 0 : i32
    %c0_i32_1 = arith.constant 0 : i32
    return %c0_i32, %c0_i32_0 : i32, i32
  }
  func.func @transform_2(%arg0: i32) -> (i32, i32) {
    %c0_i32 = arith.constant 0 : i32
    %c0_i32_0 = arith.constant 0 : i32
    %c0_i32_1 = arith.constant 0 : i32
    return %c0_i32, %c0_i32_0 : i32, i32
  }
  func.func @transform_3(%arg0: i32) -> (i32, i32) {
    %c0_i32 = arith.constant 0 : i32
    %c0_i32_0 = arith.constant 0 : i32
    return %arg0, %c0_i32 : i32, i32
  }
}

module attributes {stable_mosaic.version = 11 : i64} {
  func.func @_conv_mm_kernel(%arg0: i32, %arg1: memref<2x1024xbf16, #tpu.memory_space<vmem>>, %arg2: memref<1024x128xbf16, #tpu.memory_space<vmem>>, %arg3: memref<1x128xf32, #tpu.memory_space<vmem>>, %arg4: memref<2x128xf32, #tpu.memory_space<vmem>>) attributes {dimension_semantics = [#tpu.dimension_semantics<parallel>], iteration_bounds = array<i64: 1>, scalar_prefetch = 0 : i64, scratch_operands = 0 : i64, tpu.core_type = #tpu.core_type<tc>, window_params = [{transform_indices = @transform_0, window_bounds = array<i64: 2, 1024>}, {pipeline_mode = #tpu.pipeline_mode<synchronous>, transform_indices = @transform_1, window_bounds = array<i64: 1024, 128>}, {pipeline_mode = #tpu.pipeline_mode<synchronous>, transform_indices = @transform_2, window_bounds = array<i64: 1, 128>}, {transform_indices = @transform_3, window_bounds = array<i64: 2, 128>}]} {
    %c0 = arith.constant 0 : index
    %c0_0 = arith.constant 0 : index
    %0 = vector.load %arg1[%c0, %c0_0] : memref<2x1024xbf16, #tpu.memory_space<vmem>>, vector<2x1024xbf16>
    %c0_1 = arith.constant 0 : index
    %c0_2 = arith.constant 0 : index
    %1 = vector.load %arg2[%c0_1, %c0_2] : memref<1024x128xbf16, #tpu.memory_space<vmem>>, vector<1024x128xbf16>
    %cst = arith.constant dense<0.000000e+00> : vector<2x128xf32>
    %2 = tpu.matmul %0, %1, %cst {dimension_numbers = #tpu.dot_dimension_numbers<[1], [0], [0], [1], [0, 0, 1, 1], [], []>} : vector<2x1024xbf16>, vector<1024x128xbf16>, vector<2x128xf32> -> vector<2x128xf32>
    %c0_3 = arith.constant 0 : index
    %c0_4 = arith.constant 0 : index
    %3 = vector.load %arg3[%c0_3, %c0_4] : memref<1x128xf32, #tpu.memory_space<vmem>>, vector<1x128xf32>
    %4 = vector.broadcast %3 : vector<1x128xf32> to vector<2x128xf32>
    %5 = arith.addf %2, %4 : vector<2x128xf32>
    %c0_5 = arith.constant 0 : index
    %c0_6 = arith.constant 0 : index
    %6 = vector.load %arg4[%c0_5, %c0_6] : memref<2x128xf32, #tpu.memory_space<vmem>>, vector<2x128xf32>
    tpu.vector_store %arg4[%c0_5, %c0_6], %5 {strides = array<i32>} : memref<2x128xf32, #tpu.memory_space<vmem>>, vector<2x128xf32>,
    return
  }
  func.func @transform_0(%arg0: i32) -> (i32, i32) {
    %c0_i32 = arith.constant 0 : i32
    %c0_i32_0 = arith.constant 0 : i32
    return %arg0, %c0_i32 : i32, i32
  }
  func.func @transform_1(%arg0: i32) -> (i32, i32) {
    %c0_i32 = arith.constant 0 : i32
    %c0_i32_0 = arith.constant 0 : i32
    %c0_i32_1 = arith.constant 0 : i32
    return %c0_i32, %c0_i32_0 : i32, i32
  }
  func.func @transform_2(%arg0: i32) -> (i32, i32) {
    %c0_i32 = arith.constant 0 : i32
    %c0_i32_0 = arith.constant 0 : i32
    %c0_i32_1 = arith.constant 0 : i32
    return %c0_i32, %c0_i32_0 : i32, i32
  }
  func.func @transform_3(%arg0: i32) -> (i32, i32) {
    %c0_i32 = arith.constant 0 : i32
    %c0_i32_0 = arith.constant 0 : i32
    return %arg0, %c0_i32 : i32, i32
  }
}

</mosaic_0001>

<bundles_post_ra>
// kernel: netD_forward.5
= control target key start
LH: loop header
LB: loop body
LE: loop exit
PB: predicated region body
PF: predicated region fallthrough
CT: control target
= control target key end

     0   :  { %s1964_s12 = smov 0   ;;  %s2175_s0 = inlined_call_operand.vmem [shape: bf16[2048,48], index: 0, kind: input, shape index: {}]   ;;  %s2176_s1 = inlined_call_operand.vmem [shape: bf16[48,128], index: 1, kind: input, shape index: {}]   ;;  %s2177_s2 = inlined_call_operand.vmem [shape: f32[1,128], index: 2, kind: input, shape index: {}]   ;;  %s2178_s3 = inlined_call_operand.vmem [shape: bf16[2048,128], index: 3, kind: output, shape index: {}]  }
   0x1 LB: > { %s1384_s13 = sadd.s32 4294967295, %s1942_s12   ;;  %p1388_p0 = scmp.ge.s32.totalorder %s1942_s12, 1  ;;  %s1942_s12 = sphi %s1964_s12, %s13_s12  }
   0x2   : > { %p138_p1 = scmp.lt.s32.totalorder %s1942_s12, 5 }
   0x4   : > { %p139_p2 = pnand %p1388_p0, %p138_p1 }
   0x5   : > { %v1901_v0 = vld [vmem:[%s2176_s1] sm:$0xff] (!%p139_p2)   ;;  %s1389_s16 = sshll.u32 (!%p139_p2), %s1384_s13, 6  ;;  %v1902_v1 = vld [vmem:[%s2176_s1 + $0x8] sm:$0xff] (!%p139_p2)   ;;  %v1903_v2 = vld [vmem:[%s2176_s1 + $0x10] sm:$0xff] (!%p139_p2)   ;;  %vm430_vm0 = vcmask (!%p139_p2), 392192  }
   0x6   : > { %142 = sbr.rel (%p139_p2) target bundleno = 307 (0x133), region = 32  ;;  %p163_p3 = scmp.lt.s32.totalorder (!%p139_p2), %s1389_s16, 255  ;;  %1817 = vmatprep.subr.bf16.mxu0 (!%p139_p2), %v1901_v0  ;;  %1887 = vmatprep.subr.bf16.mxu1 (!%p139_p2), %v1901_v0  ;;  %v2058_v35 = vld [vmem:[%s2177_s2] ss:$0 sm:$0xff] (!%p139_p2) }
   0x7   : > { %1818 = vmatpush3.bf16.msra.mxu0 (!%p139_p2), %v1901_v0  ;;  %1890 = vmatpush3.bf16.msra.mxu1 (!%p139_p2), %v1901_v0 }
   0x8   : > { %1819 = vmatprep.subr.bf16.mxu0 (!%p139_p2), %v1902_v1  ;;  %1888 = vmatprep.subr.bf16.mxu1 (!%p139_p2), %v1902_v1 }
   0xb   : > { %1820 = vmatpush3.bf16.msra.mxu0 (!%p139_p2), %v1902_v1  ;;  %1891 = vmatpush3.bf16.msra.mxu1 (!%p139_p2), %v1902_v1 }
   0xc   : > { %1821 = vmatprep.subr.bf16.mxu0 (!%p139_p2), %v1903_v2  ;;  %1889 = vmatprep.subr.bf16.mxu1 (!%p139_p2), %v1903_v2 }
   0xd   : > { %s2180_s16 = smov (!%p163_p3, %s1389_s16), 255 }
   0xe   : > { %s1390_s21 = sshll.u32 %s2180_s16, 2 }
   0xf   : > { %s1989_s24 = scalar_lea.vmem %s2175_s0, %s1390_s21  ;;  %1822 = vmatpush3.bf16.msra.mxu0 %v1903_v2  ;;  %1892 = vmatpush3.bf16.msra.mxu1 %v1903_v2  ;;  %s2075_s29 = scalar_lea.vmem %s2178_s3, %s1390_s21 }
  0x10   : > { %v1904_v3 = vld [vmem:[%s1989_s24] sm:$0xff]   ;;  %v1906_v5 = vld [vmem:[%s1989_s24 + $0x8] sm:$0xff]   ;;  %v1908_v7 = vld [vmem:[%s1989_s24 + $0x10] sm:$0xff]  }
  0x11   : > { %v1905_v4 = vld [vmem:[%s1989_s24 + $0x80] sm:$0xff]   ;;  %1823 = vmatprep.mubr.msk.bf16.mxu0 %vm430_vm0, %v1904_v3  ;;  %v1907_v6 = vld [vmem:[%s1989_s24 + $0x88] sm:$0xff]   ;;  %v1909_v8 = vld [vmem:[%s1989_s24 + $0x90] sm:$0xff]  }
  0x12   : > { %1855 = vmatprep.mubr.msk.bf16.mxu1 %vm430_vm0, %v1905_v4  ;;  %1824 = vmatmul.mubr.msk.bf16.vlgmr.msra.gmra.mrb[0].mxu0 %vm430_vm0, %v1906_v5  ;;  %v1910_v9 = vld [vmem:[%s1989_s24 + $0x18] sm:$0xff]   ;;  %v1912_v11 = vld [vmem:[%s1989_s24 + $0x20] sm:$0xff]   ;;  %v1914_v13 = vld [vmem:[%s1989_s24 + $0x28] sm:$0xff]  }
  0x13   : > { %1856 = vmatmul.mubr.msk.bf16.vlgmr.msra.gmra.mrb[0].mxu1 %vm430_vm0, %v1907_v6  ;;  %1827 = vmatprep.mubr.msk.bf16.mxu0 %vm430_vm0, %v1908_v7  ;;  %v1911_v10 = vld [vmem:[%s1989_s24 + $0x98] sm:$0xff]   ;;  %v1913_v12 = vld [vmem:[%s1989_s24 + $0xa0] sm:$0xff]   ;;  %v1915_v14 = vld [vmem:[%s1989_s24 + $0xa8] sm:$0xff]  }
  0x14   : > { %1859 = vmatprep.mubr.msk.bf16.mxu1 %vm430_vm0, %v1909_v8  ;;  %v1916_v15 = vld [vmem:[%s1989_s24 + $0x30] sm:$0xff]   ;;  %v1918_v17 = vld [vmem:[%s1989_s24 + $0x38] sm:$0xff]   ;;  %v1920_v19 = vld [vmem:[%s1989_s24 + $0x40] sm:$0xff]  }
  0x15   : > { %v1917_v16 = vld [vmem:[%s1989_s24 + $0xb0] sm:$0xff]   ;;  %v1919_v18 = vld [vmem:[%s1989_s24 + $0xb8] sm:$0xff]   ;;  %v1921_v20 = vld [vmem:[%s1989_s24 + $0xc0] sm:$0xff]  }
  0x16   : > { %v1922_v21 = vld [vmem:[%s1989_s24 + $0x48] sm:$0xff]   ;;  %v1924_v23 = vld [vmem:[%s1989_s24 + $0x50] sm:$0xff]   ;;  %v1926_v25 = vld [vmem:[%s1989_s24 + $0x58] sm:$0xff]  }
  0x17   : > { %v1923_v22 = vld [vmem:[%s1989_s24 + $0xc8] sm:$0xff]   ;;  %v1925_v24 = vld [vmem:[%s1989_s24 + $0xd0] sm:$0xff]   ;;  %v1927_v26 = vld [vmem:[%s1989_s24 + $0xd8] sm:$0xff]  }
  0x18   : > { %v1928_v27 = vld [vmem:[%s1989_s24 + $0x60] sm:$0xff]   ;;  %v1930_v29 = vld [vmem:[%s1989_s24 + $0x68] sm:$0xff]   ;;  %v1932_v31 = vld [vmem:[%s1989_s24 + $0x70] sm:$0xff]  }
  0x19   : > { %v1929_v28 = vld [vmem:[%s1989_s24 + $0xe0] sm:$0xff]   ;;  %v1931_v30 = vld [vmem:[%s1989_s24 + $0xe8] sm:$0xff]   ;;  %v1933_v32 = vld [vmem:[%s1989_s24 + $0xf0] sm:$0xff]  }
  0x1a   : > { %1828 = vmatmul.mubr.msk.bf16.gmra.mrb[4].mxu0 %vm430_vm0, %v1910_v9  ;;  %v1934_v33 = vld [vmem:[%s1989_s24 + $0x78] sm:$0xff]  }
  0x1b   : > { %1860 = vmatmul.mubr.msk.bf16.gmra.mrb[4].mxu1 %vm430_vm0, %v1911_v10  ;;  %1831 = vmatprep.mubr.msk.bf16.mxu0 %vm430_vm0, %v1912_v11  ;;  %v1935_v34 = vld [vmem:[%s1989_s24 + $0xf8] sm:$0xff]  }
  0x1c   : > { %1863 = vmatprep.mubr.msk.bf16.mxu1 %vm430_vm0, %v1913_v12 }
  0x22   : > { %1832 = vmatmul.mubr.msk.bf16.gmra.mrb[8].mxu0 %vm430_vm0, %v1914_v13 }
  0x23   : > { %1864 = vmatmul.mubr.msk.bf16.gmra.mrb[8].mxu1 %vm430_vm0, %v1915_v14  ;;  %1835 = vmatprep.mubr.msk.bf16.mxu0 %vm430_vm0, %v1916_v15 }
  0x24   : > { %1867 = vmatprep.mubr.msk.bf16.mxu1 %vm430_vm0, %v1917_v16 }
  0x2a   : > { %1836 = vmatmul.mubr.msk.bf16.gmra.mrb[12].mxu0 %vm430_vm0, %v1918_v17 }
  0x2b   : > { %1868 = vmatmul.mubr.msk.bf16.gmra.mrb[12].mxu1 %vm430_vm0, %v1919_v18  ;;  %1839 = vmatprep.mubr.msk.bf16.mxu0 %vm430_vm0, %v1920_v19 }
  0x2c   : > { %1871 = vmatprep.mubr.msk.bf16.mxu1 %vm430_vm0, %v1921_v20 }
  0x32   : > { %1840 = vmatmul.mubr.msk.bf16.gmra.mrb[16].mxu0 %vm430_vm0, %v1922_v21 }
  0x33   : > { %1872 = vmatmul.mubr.msk.bf16.gmra.mrb[16].mxu1 %vm430_vm0, %v1923_v22  ;;  %1843 = vmatprep.mubr.msk.bf16.mxu0 %vm430_vm0, %v1924_v23 }
  0x34   : > { %1875 = vmatprep.mubr.msk.bf16.mxu1 %vm430_vm0, %v1925_v24 }
  0x3a   : > { %1844 = vmatmul.mubr.msk.bf16.gmra.mrb[20].mxu0 %vm430_vm0, %v1926_v25 }
  0x3b   : > { %1876 = vmatmul.mubr.msk.bf16.gmra.mrb[20].mxu1 %vm430_vm0, %v1927_v26  ;;  %1847 = vmatprep.mubr.msk.bf16.mxu0 %vm430_vm0, %v1928_v27 }
  0x3c   : > { %1879 = vmatprep.mubr.msk.bf16.mxu1 %vm430_vm0, %v1929_v28 }
  0x42   : > { %1848 = vmatmul.mubr.msk.bf16.gmra.mrb[24].mxu0 %vm430_vm0, %v1930_v29 }
  0x43   : > { %1880 = vmatmul.mubr.msk.bf16.gmra.mrb[24].mxu1 %vm430_vm0, %v1931_v30  ;;  %1851 = vmatprep.mubr.msk.bf16.mxu0 %vm430_vm0, %v1932_v31 }
  0x44   : > { %1883 = vmatprep.mubr.msk.bf16.mxu1 %vm430_vm0, %v1933_v32 }
  0x4a   : > { %1852 = vmatmul.mubr.msk.bf16.gmra.mrb[28].mxu0 %vm430_vm0, %v1934_v33 }
  0x4b   : > { %1884 = vmatmul.mubr.msk.bf16.gmra.mrb[28].mxu1 %vm430_vm0, %v1935_v34 }
  0xe5   : > { %v1825_v36 = vpop.f32.mrb[0].mxu0 }
  0xe6   : > { %v1857_v37 = vpop.f32.mrb[0].mxu1  ;;  %v570_v38 = vadd.f32 %v1825_v36, %v2058_v35  ;;  %v561_v40 = vpop.f32.mrb[1].mxu0 }
  0xe7   : > { %v698_v39 = vadd.f32 %v1857_v37, %v2058_v35  ;;  %v689_v41 = vpop.f32.mrb[1].mxu1  ;;  %v562_v42 = vadd.f32 %v2058_v35, %v561_v40  ;;  %v1826_v44 = vpop.f32.mrb[2].mxu0 }
  0xe8   : > { %v690_v43 = vadd.f32 %v2058_v35, %v689_v41  ;;  %v1858_v45 = vpop.f32.mrb[2].mxu1  ;;  %vm818_vm1 = vcmp.gt.f32.partialorder %v570_v38, 0.0  ;;  %v882_v46 = vmul.f32 0.2, %v570_v38  ;;  %v573_v50 = vadd.f32 %v1826_v44, %v2058_v35  ;;  %v564_v52 = vpop.f32.mrb[3].mxu0 }
  0xe9   : > { %vm850_vm2 = vcmp.gt.f32.partialorder %v698_v39, 0.0  ;;  %v914_v47 = vmul.f32 0.2, %v698_v39  ;;  %vm816_vm3 = vcmp.gt.f32.partialorder %v562_v42, 0.0  ;;  %v880_v48 = vmul.f32 0.2, %v562_v42 }
  0xea   : > { %vm848_vm4 = vcmp.gt.f32.partialorder %v690_v43, 0.0  ;;  %v912_v49 = vmul.f32 0.2, %v690_v43  ;;  %v701_v51 = vadd.f32 %v1858_v45, %v2058_v35  ;;  %v692_v53 = vpop.f32.mrb[3].mxu1  ;;  %v946_v54 = vsel %vm818_vm1, %v570_v38, %v882_v46 }
  0xeb   : > { %v978_v55 = vsel %vm850_vm2, %v698_v39, %v914_v47  ;;  %v565_v56 = vadd.f32 %v2058_v35, %v564_v52  ;;  %v693_v57 = vadd.f32 %v2058_v35, %v692_v53  ;;  %vm819_vm5 = vcmp.gt.f32.partialorder %v573_v50, 0.0 }
  0xec   : > { %v883_v58 = vmul.f32 0.2, %v573_v50  ;;  %vm851_vm6 = vcmp.gt.f32.partialorder %v701_v51, 0.0  ;;  %v915_v59 = vmul.f32 0.2, %v701_v51  ;;  %v944_v62 = vsel %vm816_vm3, %v562_v42, %v880_v48 }
  0xed   : > { %vm817_vm7 = vcmp.gt.f32.partialorder %v565_v56, 0.0  ;;  %v881_v60 = vmul.f32 0.2, %v565_v56  ;;  %vm849_vm8 = vcmp.gt.f32.partialorder %v693_v57, 0.0  ;;  %v913_v61 = vmul.f32 0.2, %v693_v57 }
  0xee   : > { %v976_v63 = vsel %vm848_vm4, %v690_v43, %v912_v49  ;;  %v947_v0 = vsel %vm819_vm5, %v573_v50, %v883_v58  ;;  %v979_v1 = vsel %vm851_vm6, %v701_v51, %v915_v59  ;;  %v1829_v2 = vpop.f32.mrb[4].mxu0  ;;  %v1861_v3 = vpop.f32.mrb[4].mxu1 }
  0xef   : > { %v1599_v4 = vpack.c.bf16 %v947_v0, %v946_v54  ;;  %v1679_v5 = vpack.c.bf16 %v979_v1, %v978_v55  ;;  %v945_v6 = vsel %vm817_vm7, %v565_v56, %v881_v60  ;;  %v977_v7 = vsel %vm849_vm8, %v693_v57, %v913_v61  ;;  %v577_v8 = vpop.f32.mrb[5].mxu0  ;;  %v705_v9 = vpop.f32.mrb[5].mxu1 }
  0xf0   : > { %v1594_v10 = vpack.c.bf16 %v945_v6, %v944_v62  ;;  %v1674_v11 = vpack.c.bf16 %v977_v7, %v976_v63  ;;  %v586_v12 = vadd.f32 %v1829_v2, %v2058_v35  ;;  %v714_v13 = vadd.f32 %v1861_v3, %v2058_v35  ;;  %v1830_v14 = vpop.f32.mrb[6].mxu0  ;;  %v1862_v15 = vpop.f32.mrb[6].mxu1 }
  0xf1   : > { %1751 = vst [vmem:[%s2075_s29 + $0x8] sm:$0xff] %v1599_v4   ;;  %1767 = vst [vmem:[%s2075_s29 + $0x88] sm:$0xff] %v1679_v5   ;;  %v578_v16 = vadd.f32 %v2058_v35, %v577_v8  ;;  %v706_v17 = vadd.f32 %v2058_v35, %v705_v9  ;;  %v589_v18 = vadd.f32 %v1830_v14, %v2058_v35  ;;  %v580_v20 = vpop.f32.mrb[7].mxu0  ;;  %v708_v21 = vpop.f32.mrb[7].mxu1 }
  0xf2   : > { %v717_v19 = vadd.f32 %v1862_v15, %v2058_v35  ;;  %1595 = vst [vmem:[%s2075_s29] sm:$0xff] %v1594_v10   ;;  %1766 = vst [vmem:[%s2075_s29 + $0x80] sm:$0xff] %v1674_v11   ;;  %vm822_vm9 = vcmp.gt.f32.partialorder %v586_v12, 0.0  ;;  %v886_v22 = vmul.f32 0.2, %v586_v12  ;;  %vm854_vm10 = vcmp.gt.f32.partialorder %v714_v13, 0.0 }
  0xf3   : > { %v918_v23 = vmul.f32 0.2, %v714_v13  ;;  %vm820_vm11 = vcmp.gt.f32.partialorder %v578_v16, 0.0  ;;  %v884_v24 = vmul.f32 0.2, %v578_v16  ;;  %vm852_vm12 = vcmp.gt.f32.partialorder %v706_v17, 0.0 }
  0xf4   : > { %v916_v25 = vmul.f32 0.2, %v706_v17  ;;  %v950_v26 = vsel %vm822_vm9, %v586_v12, %v886_v22  ;;  %vm823_vm13 = vcmp.gt.f32.partialorder %v589_v18, 0.0  ;;  %v887_v28 = vmul.f32 0.2, %v589_v18 }
  0xf5   : > { %v982_v27 = vsel %vm854_vm10, %v714_v13, %v918_v23  ;;  %v948_v29 = vsel %vm820_vm11, %v578_v16, %v884_v24  ;;  %vm855_vm14 = vcmp.gt.f32.partialorder %v717_v19, 0.0  ;;  %v919_v31 = vmul.f32 0.2, %v717_v19  ;;  %v1833_v32 = vpop.f32.mrb[8].mxu0 }
  0xf6   : > { %v980_v30 = vsel %vm852_vm12, %v706_v17, %v916_v25  ;;  %v1865_v33 = vpop.f32.mrb[8].mxu1  ;;  %v951_v34 = vsel %vm823_vm13, %v589_v18, %v887_v28  ;;  %v581_v36 = vadd.f32 %v2058_v35, %v580_v20  ;;  %v709_v37 = vadd.f32 %v2058_v35, %v708_v21  ;;  %v593_v39 = vpop.f32.mrb[9].mxu0 }
  0xf7   : > { %v602_v38 = vadd.f32 %v1833_v32, %v2058_v35  ;;  %v721_v40 = vpop.f32.mrb[9].mxu1  ;;  %v1609_v41 = vpack.c.bf16 %v951_v34, %v950_v26  ;;  %v983_v42 = vsel %vm855_vm14, %v717_v19, %v919_v31  ;;  %v730_v43 = vadd.f32 %v1865_v33, %v2058_v35  ;;  %v1834_v45 = vpop.f32.mrb[10].mxu0 }
  0xf8   : > { %v594_v44 = vadd.f32 %v2058_v35, %v593_v39  ;;  %v1866_v46 = vpop.f32.mrb[10].mxu1  ;;  %v1689_v47 = vpack.c.bf16 %v983_v42, %v982_v27  ;;  %vm821_vm15 = vcmp.gt.f32.partialorder %v581_v36, 0.0  ;;  %v885_v48 = vmul.f32 0.2, %v581_v36  ;;  %v596_v49 = vpop.f32.mrb[11].mxu0 }
  0xf9   : > { %vm853_vm0 = vcmp.gt.f32.partialorder %v709_v37, 0.0  ;;  %v724_v50 = vpop.f32.mrb[11].mxu1  ;;  %1753 = vst [vmem:[%s2075_s29 + $0x18] sm:$0xff] %v1609_v41   ;;  %v917_v51 = vmul.f32 0.2, %v709_v37  ;;  %vm826_vm1 = vcmp.gt.f32.partialorder %v602_v38, 0.0  ;;  %v722_v59 = vadd.f32 %v2058_v35, %v721_v40 }
  0xfa   : > { %v890_v52 = vmul.f32 0.2, %v602_v38  ;;  %vm858_vm2 = vcmp.gt.f32.partialorder %v730_v43, 0.0  ;;  %1769 = vst [vmem:[%s2075_s29 + $0x98] sm:$0xff] %v1689_v47   ;;  %v949_v53 = vsel %vm821_vm15, %v581_v36, %v885_v48  ;;  %v922_v54 = vmul.f32 0.2, %v730_v43 }
  0xfb   : > { %vm824_vm3 = vcmp.gt.f32.partialorder %v594_v44, 0.0  ;;  %v888_v55 = vmul.f32 0.2, %v594_v44  ;;  %v1604_v56 = vpack.c.bf16 %v949_v53, %v948_v29  ;;  %v981_v57 = vsel %vm853_vm0, %v709_v37, %v917_v51 }
  0xfc   : > { %v954_v58 = vsel %vm826_vm1, %v602_v38, %v890_v52  ;;  %v1684_v60 = vpack.c.bf16 %v981_v57, %v980_v30  ;;  %v986_v61 = vsel %vm858_vm2, %v730_v43, %v922_v54  ;;  %v605_v63 = vadd.f32 %v1834_v45, %v2058_v35 }
  0xfd   : > { %v952_v62 = vsel %vm824_vm3, %v594_v44, %v888_v55  ;;  %1752 = vst [vmem:[%s2075_s29 + $0x10] sm:$0xff] %v1604_v56   ;;  %vm856_vm4 = vcmp.gt.f32.partialorder %v722_v59, 0.0  ;;  %v920_v0 = vmul.f32 0.2, %v722_v59  ;;  %v733_v1 = vadd.f32 %v1866_v46, %v2058_v35  ;;  %v1837_v3 = vpop.f32.mrb[12].mxu0 }
  0xfe   : > { %v597_v2 = vadd.f32 %v2058_v35, %v596_v49  ;;  %v1869_v4 = vpop.f32.mrb[12].mxu1  ;;  %1768 = vst [vmem:[%s2075_s29 + $0x90] sm:$0xff] %v1684_v60   ;;  %vm827_vm5 = vcmp.gt.f32.partialorder %v605_v63, 0.0  ;;  %v891_v5 = vmul.f32 0.2, %v605_v63  ;;  %v725_v6 = vadd.f32 %v2058_v35, %v724_v50  ;;  %v609_v8 = vpop.f32.mrb[13].mxu0 }
  0xff   : > { %v618_v7 = vadd.f32 %v1837_v3, %v2058_v35  ;;  %v737_v9 = vpop.f32.mrb[13].mxu1  ;;  %v984_v10 = vsel %vm856_vm4, %v722_v59, %v920_v0  ;;  %vm859_vm6 = vcmp.gt.f32.partialorder %v733_v1, 0.0  ;;  %v923_v11 = vmul.f32 0.2, %v733_v1  ;;  %v1838_v12 = vpop.f32.mrb[14].mxu0 }
 0x100   : > { %vm825_vm7 = vcmp.gt.f32.partialorder %v597_v2, 0.0  ;;  %v1870_v13 = vpop.f32.mrb[14].mxu1  ;;  %v955_v14 = vsel %vm827_vm5, %v605_v63, %v891_v5  ;;  %v889_v15 = vmul.f32 0.2, %v597_v2  ;;  %vm857_vm8 = vcmp.gt.f32.partialorder %v725_v6, 0.0  ;;  %v612_v17 = vpop.f32.mrb[15].mxu0 }
 0x101   : > { %v921_v16 = vmul.f32 0.2, %v725_v6  ;;  %v1619_v18 = vpack.c.bf16 %v955_v14, %v954_v58  ;;  %v987_v19 = vsel %vm859_vm6, %v733_v1, %v923_v11  ;;  %vm830_vm9 = vcmp.gt.f32.partialorder %v618_v7, 0.0  ;;  %v740_v21 = vpop.f32.mrb[15].mxu1 }
 0x102   : > { %v894_v20 = vmul.f32 0.2, %v618_v7  ;;  %v1699_v22 = vpack.c.bf16 %v987_v19, %v986_v61  ;;  %v953_v23 = vsel %vm825_vm7, %v597_v2, %v889_v15  ;;  %v746_v25 = vadd.f32 %v1869_v4, %v2058_v35 }
 0x103   : > { %v985_v24 = vsel %vm857_vm8, %v725_v6, %v921_v16  ;;  %1755 = vst [vmem:[%s2075_s29 + $0x28] sm:$0xff] %v1619_v18   ;;  %v1614_v26 = vpack.c.bf16 %v953_v23, %v952_v62  ;;  %v610_v29 = vadd.f32 %v2058_v35, %v609_v8  ;;  %v738_v31 = vadd.f32 %v2058_v35, %v737_v9 }
 0x104   : > { %v1694_v27 = vpack.c.bf16 %v985_v24, %v984_v10  ;;  %v958_v28 = vsel %vm830_vm9, %v618_v7, %v894_v20  ;;  %1771 = vst [vmem:[%s2075_s29 + $0xa8] sm:$0xff] %v1699_v22   ;;  %vm862_vm10 = vcmp.gt.f32.partialorder %v746_v25, 0.0  ;;  %v926_v30 = vmul.f32 0.2, %v746_v25 }
 0x105   : > { %v621_v32 = vadd.f32 %v1838_v12, %v2058_v35  ;;  %1754 = vst [vmem:[%s2075_s29 + $0x20] sm:$0xff] %v1614_v26   ;;  %vm828_vm11 = vcmp.gt.f32.partialorder %v610_v29, 0.0  ;;  %v892_v33 = vmul.f32 0.2, %v610_v29  ;;  %v749_v34 = vadd.f32 %v1870_v13, %v2058_v35  ;;  %v1841_v37 = vpop.f32.mrb[16].mxu0 }
 0x106   : > { %1770 = vst [vmem:[%s2075_s29 + $0xa0] sm:$0xff] %v1694_v27   ;;  %v613_v36 = vadd.f32 %v2058_v35, %v612_v17  ;;  %v1873_v38 = vpop.f32.mrb[16].mxu1  ;;  %v990_v39 = vsel %vm862_vm10, %v746_v25, %v926_v30  ;;  %vm860_vm12 = vcmp.gt.f32.partialorder %v738_v31, 0.0  ;;  %v924_v40 = vmul.f32 0.2, %v738_v31  ;;  %v625_v41 = vpop.f32.mrb[17].mxu0 }
 0x107   : > { %vm831_vm13 = vcmp.gt.f32.partialorder %v621_v32, 0.0  ;;  %v753_v42 = vpop.f32.mrb[17].mxu1  ;;  %v956_v43 = vsel %vm828_vm11, %v610_v29, %v892_v33  ;;  %v895_v44 = vmul.f32 0.2, %v621_v32  ;;  %vm863_vm14 = vcmp.gt.f32.partialorder %v749_v34, 0.0  ;;  %v1842_v46 = vpop.f32.mrb[18].mxu0 }
 0x108   : > { %v927_v45 = vmul.f32 0.2, %v749_v34  ;;  %v988_v47 = vsel %vm860_vm12, %v738_v31, %v924_v40  ;;  %vm829_vm15 = vcmp.gt.f32.partialorder %v613_v36, 0.0  ;;  %v893_v48 = vmul.f32 0.2, %v613_v36  ;;  %v1874_v50 = vpop.f32.mrb[18].mxu1 }
 0x109   : > { %v741_v49 = vadd.f32 %v2058_v35, %v740_v21  ;;  %v628_v51 = vpop.f32.mrb[19].mxu0  ;;  %v959_v52 = vsel %vm831_vm13, %v621_v32, %v895_v44  ;;  %v634_v54 = vadd.f32 %v1841_v37, %v2058_v35  ;;  %v762_v55 = vadd.f32 %v1873_v38, %v2058_v35  ;;  %v756_v56 = vpop.f32.mrb[19].mxu1 }
 0x10a   : > { %v991_v53 = vsel %vm863_vm14, %v749_v34, %v927_v45  ;;  %v1629_v57 = vpack.c.bf16 %v959_v52, %v958_v28  ;;  %v957_v59 = vsel %vm829_vm15, %v613_v36, %v893_v48  ;;  %v626_v0 = vadd.f32 %v2058_v35, %v625_v41 }
 0x10b   : > { %v1709_v58 = vpack.c.bf16 %v991_v53, %v990_v39  ;;  %vm861_vm0 = vcmp.gt.f32.partialorder %v741_v49, 0.0  ;;  %v1624_v60 = vpack.c.bf16 %v957_v59, %v956_v43  ;;  %v925_v61 = vmul.f32 0.2, %v741_v49 }
 0x10c   : > { %vm834_vm1 = vcmp.gt.f32.partialorder %v634_v54, 0.0  ;;  %v898_v62 = vmul.f32 0.2, %v634_v54  ;;  %1757 = vst [vmem:[%s2075_s29 + $0x38] sm:$0xff] %v1629_v57   ;;  %vm866_vm2 = vcmp.gt.f32.partialorder %v762_v55, 0.0  ;;  %v754_v1 = vadd.f32 %v2058_v35, %v753_v42 }
 0x10d   : > { %1773 = vst [vmem:[%s2075_s29 + $0xb8] sm:$0xff] %v1709_v58   ;;  %v930_v63 = vmul.f32 0.2, %v762_v55  ;;  %1756 = vst [vmem:[%s2075_s29 + $0x30] sm:$0xff] %v1624_v60   ;;  %v989_v2 = vsel %vm861_vm0, %v741_v49, %v925_v61  ;;  %v637_v4 = vadd.f32 %v1842_v46, %v2058_v35  ;;  %v765_v5 = vadd.f32 %v1874_v50, %v2058_v35  ;;  %v1845_v6 = vpop.f32.mrb[20].mxu0 }
 0x10e   : > { %v962_v3 = vsel %vm834_vm1, %v634_v54, %v898_v62  ;;  %v1877_v7 = vpop.f32.mrb[20].mxu1  ;;  %v1704_v8 = vpack.c.bf16 %v989_v2, %v988_v47  ;;  %vm832_vm3 = vcmp.gt.f32.partialorder %v626_v0, 0.0  ;;  %v896_v10 = vmul.f32 0.2, %v626_v0  ;;  %v641_v11 = vpop.f32.mrb[21].mxu0 }
 0x10f   : > { %v994_v9 = vsel %vm866_vm2, %v762_v55, %v930_v63  ;;  %v769_v12 = vpop.f32.mrb[21].mxu1  ;;  %vm864_vm4 = vcmp.gt.f32.partialorder %v754_v1, 0.0  ;;  %v928_v13 = vmul.f32 0.2, %v754_v1  ;;  %vm835_vm5 = vcmp.gt.f32.partialorder %v637_v4, 0.0  ;;  %v1846_v18 = vpop.f32.mrb[22].mxu0 }
 0x110   : > { %v899_v14 = vmul.f32 0.2, %v637_v4  ;;  %1772 = vst [vmem:[%s2075_s29 + $0xb0] sm:$0xff] %v1704_v8   ;;  %v960_v15 = vsel %vm832_vm3, %v626_v0, %v896_v10  ;;  %vm867_vm6 = vcmp.gt.f32.partialorder %v765_v5, 0.0  ;;  %v931_v16 = vmul.f32 0.2, %v765_v5 }
 0x111   : > { %v629_v17 = vadd.f32 %v2058_v35, %v628_v51  ;;  %v1878_v19 = vpop.f32.mrb[22].mxu1  ;;  %v992_v20 = vsel %vm864_vm4, %v754_v1, %v928_v13  ;;  %v757_v22 = vadd.f32 %v2058_v35, %v756_v56  ;;  %v650_v23 = vadd.f32 %v1845_v6, %v2058_v35  ;;  %v644_v24 = vpop.f32.mrb[23].mxu0 }
 0x112   : > { %v963_v21 = vsel %vm835_vm5, %v637_v4, %v899_v14  ;;  %v772_v25 = vpop.f32.mrb[23].mxu1  ;;  %v995_v27 = vsel %vm867_vm6, %v765_v5, %v931_v16  ;;  %v778_v33 = vadd.f32 %v1877_v7, %v2058_v35  ;;  %v642_v34 = vadd.f32 %v2058_v35, %v641_v11 }
 0x113   : > { %v1639_v26 = vpack.c.bf16 %v963_v21, %v962_v3  ;;  %vm833_vm7 = vcmp.gt.f32.partialorder %v629_v17, 0.0  ;;  %v897_v28 = vmul.f32 0.2, %v629_v17  ;;  %v1719_v29 = vpack.c.bf16 %v995_v27, %v994_v9 }
 0x114   : > { %vm865_vm8 = vcmp.gt.f32.partialorder %v757_v22, 0.0  ;;  %v929_v30 = vmul.f32 0.2, %v757_v22  ;;  %vm838_vm9 = vcmp.gt.f32.partialorder %v650_v23, 0.0  ;;  %v902_v32 = vmul.f32 0.2, %v650_v23 }
 0x115   : > { %1759 = vst [vmem:[%s2075_s29 + $0x48] sm:$0xff] %v1639_v26   ;;  %v961_v31 = vsel %vm833_vm7, %v629_v17, %v897_v28  ;;  %1775 = vst [vmem:[%s2075_s29 + $0xc8] sm:$0xff] %v1719_v29   ;;  %v770_v38 = vadd.f32 %v2058_v35, %v769_v12  ;;  %v653_v39 = vadd.f32 %v1846_v18, %v2058_v35  ;;  %v1849_v40 = vpop.f32.mrb[24].mxu0  ;;  %vm870_vm10 = vcmp.gt.f32.partialorder %v778_v33, 0.0 }
 0x116   : > { %v1634_v36 = vpack.c.bf16 %v961_v31, %v960_v15  ;;  %v993_v37 = vsel %vm865_vm8, %v757_v22, %v929_v30  ;;  %v1881_v41 = vpop.f32.mrb[24].mxu1  ;;  %v934_v43 = vmul.f32 0.2, %v778_v33  ;;  %v657_v44 = vpop.f32.mrb[25].mxu0  ;;  %v966_v46 = vsel %vm838_vm9, %v650_v23, %v902_v32 }
 0x117   : > { %v1714_v42 = vpack.c.bf16 %v993_v37, %v992_v20  ;;  %v785_v45 = vpop.f32.mrb[25].mxu1  ;;  %vm836_vm11 = vcmp.gt.f32.partialorder %v642_v34, 0.0  ;;  %v900_v47 = vmul.f32 0.2, %v642_v34  ;;  %v932_v48 = vmul.f32 0.2, %v770_v38 }
 0x118   : > { %1758 = vst [vmem:[%s2075_s29 + $0x40] sm:$0xff] %v1634_v36   ;;  %vm868_vm12 = vcmp.gt.f32.partialorder %v770_v38, 0.0  ;;  %vm839_vm13 = vcmp.gt.f32.partialorder %v653_v39, 0.0  ;;  %v903_v49 = vmul.f32 0.2, %v653_v39  ;;  %v781_v50 = vadd.f32 %v1878_v19, %v2058_v35  ;;  %v1850_v51 = vpop.f32.mrb[26].mxu0 }
 0x119   : > { %1774 = vst [vmem:[%s2075_s29 + $0xc0] sm:$0xff] %v1714_v42   ;;  %v1882_v52 = vpop.f32.mrb[26].mxu1  ;;  %v998_v53 = vsel %vm870_vm10, %v778_v33, %v934_v43  ;;  %v964_v54 = vsel %vm836_vm11, %v642_v34, %v900_v47  ;;  %v645_v55 = vadd.f32 %v2058_v35, %v644_v24  ;;  %v773_v56 = vadd.f32 %v2058_v35, %v772_v25  ;;  %v660_v57 = vpop.f32.mrb[27].mxu0 }
 0x11a   : > { %v788_v58 = vpop.f32.mrb[27].mxu1  ;;  %v967_v59 = vsel %vm839_vm13, %v653_v39, %v903_v49  ;;  %vm871_vm14 = vcmp.gt.f32.partialorder %v781_v50, 0.0  ;;  %v935_v60 = vmul.f32 0.2, %v781_v50  ;;  %v666_v61 = vadd.f32 %v1849_v40, %v2058_v35 }
 0x11b   : > { %v1649_v62 = vpack.c.bf16 %v967_v59, %v966_v46  ;;  %vm837_vm15 = vcmp.gt.f32.partialorder %v645_v55, 0.0  ;;  %v901_v63 = vmul.f32 0.2, %v645_v55  ;;  %vm869_vm0 = vcmp.gt.f32.partialorder %v773_v56, 0.0 }
 0x11c   : > { %v999_v0 = vsel %vm871_vm14, %v781_v50, %v935_v60  ;;  %v933_v1 = vmul.f32 0.2, %v773_v56  ;;  %vm842_vm1 = vcmp.gt.f32.partialorder %v666_v61, 0.0  ;;  %v906_v2 = vmul.f32 0.2, %v666_v61 }
 0x11d   : > { %1761 = vst [vmem:[%s2075_s29 + $0x58] sm:$0xff] %v1649_v62   ;;  %v1729_v3 = vpack.c.bf16 %v999_v0, %v998_v53  ;;  %v965_v4 = vsel %vm837_vm15, %v645_v55, %v901_v63  ;;  %v794_v5 = vadd.f32 %v1881_v41, %v2058_v35  ;;  %v658_v6 = vadd.f32 %v2058_v35, %v657_v44  ;;  %v1853_v7 = vpop.f32.mrb[28].mxu0 }
 0x11e   : > { %v1885_v8 = vpop.f32.mrb[28].mxu1  ;;  %v996_v9 = vsel %vm868_vm12, %v770_v38, %v932_v48  ;;  %v1644_v10 = vpack.c.bf16 %v965_v4, %v964_v54  ;;  %v997_v11 = vsel %vm869_vm0, %v773_v56, %v933_v1  ;;  %v786_v12 = vadd.f32 %v2058_v35, %v785_v45  ;;  %v673_v13 = vpop.f32.mrb[29].mxu0 }
 0x11f   : > { %v801_v14 = vpop.f32.mrb[29].mxu1  ;;  %1777 = vst [vmem:[%s2075_s29 + $0xd8] sm:$0xff] %v1729_v3   ;;  %v1724_v15 = vpack.c.bf16 %v997_v11, %v996_v9  ;;  %vm874_vm2 = vcmp.gt.f32.partialorder %v794_v5, 0.0  ;;  %v938_v16 = vmul.f32 0.2, %v794_v5  ;;  %vm840_vm3 = vcmp.gt.f32.partialorder %v658_v6, 0.0 }
 0x120   : > { %v1854_v17 = vpop.f32.mrb[30].mxu0  ;;  %v1886_v18 = vpop.f32.mrb[30].mxu1  ;;  %1760 = vst [vmem:[%s2075_s29 + $0x50] sm:$0xff] %v1644_v10   ;;  %v970_v19 = vsel %vm842_vm1, %v666_v61, %v906_v2  ;;  %v904_v20 = vmul.f32 0.2, %v658_v6  ;;  %vm872_vm4 = vcmp.gt.f32.partialorder %v786_v12, 0.0  ;;  %v669_v21 = vadd.f32 %v1850_v51, %v2058_v35 }
 0x121   : > { %v676_v22 = vpop.f32.mrb[31].mxu0  ;;  %1776 = vst [vmem:[%s2075_s29 + $0xd0] sm:$0xff] %v1724_v15   ;;  %v936_v23 = vmul.f32 0.2, %v786_v12  ;;  %v797_v24 = vadd.f32 %v1882_v52, %v2058_v35  ;;  %v661_v25 = vadd.f32 %v2058_v35, %v660_v57  ;;  %v789_v26 = vadd.f32 %v2058_v35, %v788_v58  ;;  %v804_v27 = vpop.f32.mrb[31].mxu1 }
 0x122   : > { %v1002_v28 = vsel %vm874_vm2, %v794_v5, %v938_v16  ;;  %v968_v29 = vsel %vm840_vm3, %v658_v6, %v904_v20  ;;  %vm843_vm5 = vcmp.gt.f32.partialorder %v669_v21, 0.0  ;;  %v907_v30 = vmul.f32 0.2, %v669_v21 }
 0x123   : > { %vm875_vm6 = vcmp.gt.f32.partialorder %v797_v24, 0.0  ;;  %v939_v31 = vmul.f32 0.2, %v797_v24  ;;  %vm841_vm7 = vcmp.gt.f32.partialorder %v661_v25, 0.0  ;;  %v905_v32 = vmul.f32 0.2, %v661_v25 }
 0x124   : > { %v971_v33 = vsel %vm843_vm5, %v669_v21, %v907_v30  ;;  %vm873_vm8 = vcmp.gt.f32.partialorder %v789_v26, 0.0  ;;  %v937_v34 = vmul.f32 0.2, %v789_v26  ;;  %v682_v36 = vadd.f32 %v1853_v7, %v2058_v35 }
 0x125   : > { %v1659_v37 = vpack.c.bf16 %v971_v33, %v970_v19  ;;  %v1003_v38 = vsel %vm875_vm6, %v797_v24, %v939_v31  ;;  %v969_v39 = vsel %vm841_vm7, %v661_v25, %v905_v32  ;;  %v810_v40 = vadd.f32 %v1885_v8, %v2058_v35 }
 0x126   : > { %v1000_v41 = vsel %vm872_vm4, %v786_v12, %v936_v23  ;;  %v1739_v42 = vpack.c.bf16 %v1003_v38, %v1002_v28  ;;  %v1654_v43 = vpack.c.bf16 %v969_v39, %v968_v29  ;;  %v1001_v44 = vsel %vm873_vm8, %v789_v26, %v937_v34 }
 0x127   : > { %1763 = vst [vmem:[%s2075_s29 + $0x68] sm:$0xff] %v1659_v37   ;;  %v1734_v45 = vpack.c.bf16 %v1001_v44, %v1000_v41  ;;  %vm846_vm9 = vcmp.gt.f32.partialorder %v682_v36, 0.0  ;;  %v910_v46 = vmul.f32 0.2, %v682_v36  ;;  %v942_v47 = vmul.f32 0.2, %v810_v40 }
 0x128   : > { %1779 = vst [vmem:[%s2075_s29 + $0xe8] sm:$0xff] %v1739_v42   ;;  %1762 = vst [vmem:[%s2075_s29 + $0x60] sm:$0xff] %v1654_v43   ;;  %v674_v48 = vadd.f32 %v2058_v35, %v673_v13  ;;  %v802_v49 = vadd.f32 %v2058_v35, %v801_v14  ;;  %v685_v50 = vadd.f32 %v1854_v17, %v2058_v35  ;;  %vm878_vm10 = vcmp.gt.f32.partialorder %v810_v40, 0.0 }
 0x129   : > { %v813_v51 = vadd.f32 %v1886_v18, %v2058_v35  ;;  %1778 = vst [vmem:[%s2075_s29 + $0xe0] sm:$0xff] %v1734_v45   ;;  %v677_v52 = vadd.f32 %v2058_v35, %v676_v22  ;;  %v805_v53 = vadd.f32 %v2058_v35, %v804_v27  ;;  %v974_v54 = vsel %vm846_vm9, %v682_v36, %v910_v46 }
 0x12a   : > { %vm844_vm11 = vcmp.gt.f32.partialorder %v674_v48, 0.0  ;;  %v908_v55 = vmul.f32 0.2, %v674_v48  ;;  %v940_v56 = vmul.f32 0.2, %v802_v49  ;;  %vm847_vm12 = vcmp.gt.f32.partialorder %v685_v50, 0.0 }
 0x12b   : > { %v911_v57 = vmul.f32 0.2, %v685_v50  ;;  %vm879_vm13 = vcmp.gt.f32.partialorder %v813_v51, 0.0  ;;  %v943_v58 = vmul.f32 0.2, %v813_v51  ;;  %v1006_v59 = vsel %vm878_vm10, %v810_v40, %v942_v47 }
 0x12c   : > { %vm876_vm14 = vcmp.gt.f32.partialorder %v802_v49, 0.0  ;;  %vm845_vm15 = vcmp.gt.f32.partialorder %v677_v52, 0.0  ;;  %v909_v60 = vmul.f32 0.2, %v677_v52  ;;  %vm877_vm0 = vcmp.gt.f32.partialorder %v805_v53, 0.0 }
 0x12d   : > { %v975_v61 = vsel %vm847_vm12, %v685_v50, %v911_v57  ;;  %v1007_v62 = vsel %vm879_vm13, %v813_v51, %v943_v58  ;;  %v941_v35 = vmul.f32 0.2, %v805_v53  ;;  %v972_v63 = vsel %vm844_vm11, %v674_v48, %v908_v55 }
 0x12e   : > { %v1669_v0 = vpack.c.bf16 %v975_v61, %v974_v54  ;;  %v1749_v1 = vpack.c.bf16 %v1007_v62, %v1006_v59  ;;  %v973_v2 = vsel %vm845_vm15, %v677_v52, %v909_v60  ;;  %v1004_v3 = vsel %vm876_vm14, %v802_v49, %v940_v56 }
 0x12f   : > { %v1664_v4 = vpack.c.bf16 %v973_v2, %v972_v63  ;;  %v1005_v5 = vsel %vm877_vm0, %v805_v53, %v941_v35 }
 0x130   : > { %1765 = vst [vmem:[%s2075_s29 + $0x78] sm:$0xff] %v1669_v0   ;;  %1781 = vst [vmem:[%s2075_s29 + $0xf8] sm:$0xff] %v1749_v1   ;;  %v1744_v6 = vpack.c.bf16 %v1005_v5, %v1004_v3 }
 0x131   : > { %1764 = vst [vmem:[%s2075_s29 + $0x70] sm:$0xff] %v1664_v4  }
 0x132   : > { %1780 = vst [vmem:[%s2075_s29 + $0xf0] sm:$0xff] %v1744_v6  }
 0x133 PF: > { %s13_s12 = sadd.s32 1, %s1942_s12  }
 0x134   : > { %p10_p4 = scmp.ge.s32.totalorder %s13_s12, 6  }
 0x136   :  { %12 = sbr.rel (!%p10_p4) target bundleno = 1 (0x1), region = 62 }

// kernel: netD_forward.6
= control target key start
LH: loop header
LB: loop body
LE: loop exit
PB: predicated region body
PF: predicated region fallthrough
CT: control target
= control target key end

     0   :  { %s1190_s12 = smov 0   ;;  %s1317_s0 = inlined_call_operand.vmem [shape: bf16[512,128], index: 0, kind: input, shape index: {}]   ;;  %s1318_s1 = inlined_call_operand.vmem [shape: bf16[128,128], index: 1, kind: input, shape index: {}]   ;;  %s1319_s2 = inlined_call_operand.vmem [shape: f32[1,128], index: 2, kind: input, shape index: {}]   ;;  %s1320_s3 = inlined_call_operand.vmem [shape: bf16[512,128], index: 3, kind: output, shape index: {}]  }
   0x1 LB: > { %s847_s13 = sadd.s32 4294967295, %s1168_s12   ;;  %p851_p0 = scmp.ge.s32.totalorder %s1168_s12, 1  ;;  %s1168_s12 = sphi %s1190_s12, %s13_s12  }
   0x2   : > { %p138_p1 = scmp.lt.s32.totalorder %s1168_s12, 3 }
   0x4   : > { %p139_p2 = pnand %p851_p0, %p138_p1 }
   0x5   : > { %v1138_v0 = vld [vmem:[%s1318_s1] sm:$0xff] (!%p139_p2)   ;;  %s852_s16 = sshll.u32 (!%p139_p2), %s847_s13, 5  ;;  %v1139_v1 = vld [vmem:[%s1318_s1 + $0x8] sm:$0xff] (!%p139_p2)   ;;  %v1140_v2 = vld [vmem:[%s1318_s1 + $0x10] sm:$0xff] (!%p139_p2)  }
   0x6   : > { %142 = sbr.rel (%p139_p2) target bundleno = 293 (0x125), region = 32  ;;  %p163_p3 = scmp.lt.s32.totalorder (!%p139_p2), %s852_s16, 63  ;;  %1066 = vmatprep.subr.bf16.mxu0 (!%p139_p2), %v1138_v0  ;;  %1114 = vmatprep.subr.bf16.mxu1 (!%p139_p2), %v1138_v0  ;;  %v1141_v3 = vld [vmem:[%s1318_s1 + $0x18] sm:$0xff] (!%p139_p2)   ;;  %v1142_v6 = vld [vmem:[%s1318_s1 + $0x20] sm:$0xff] (!%p139_p2)   ;;  %v1143_v7 = vld [vmem:[%s1318_s1 + $0x28] sm:$0xff] (!%p139_p2)  }
   0x7   : > { %1067 = vmatpush3.bf16.msra.mxu0 (!%p139_p2), %v1138_v0  ;;  %1122 = vmatpush3.bf16.msra.mxu1 (!%p139_p2), %v1138_v0  ;;  %v1144_v8 = vld [vmem:[%s1318_s1 + $0x30] sm:$0xff] (!%p139_p2)   ;;  %v1145_v9 = vld [vmem:[%s1318_s1 + $0x38] sm:$0xff] (!%p139_p2)   ;;  %v1251_v24 = vld [vmem:[%s1319_s2] ss:$0 sm:$0xff] (!%p139_p2) }
   0x8   : > { %1068 = vmatprep.subr.bf16.mxu0 (!%p139_p2), %v1139_v1  ;;  %1115 = vmatprep.subr.bf16.mxu1 (!%p139_p2), %v1139_v1 }
   0xb   : > { %1069 = vmatpush3.bf16.msra.mxu0 (!%p139_p2), %v1139_v1  ;;  %1123 = vmatpush3.bf16.msra.mxu1 (!%p139_p2), %v1139_v1 }
   0xc   : > { %1070 = vmatprep.subr.bf16.mxu0 (!%p139_p2), %v1140_v2  ;;  %1116 = vmatprep.subr.bf16.mxu1 (!%p139_p2), %v1140_v2 }
   0xd   : > { %s1322_s16 = smov (!%p163_p3, %s852_s16), 63 }
   0xe   : > { %s853_s21 = sshll.u32 %s1322_s16, 2 }
   0xf   : > { %s1215_s24 = scalar_lea.vmem %s1317_s0, %s853_s21  ;;  %1071 = vmatpush3.bf16.msra.mxu0 %v1140_v2  ;;  %1124 = vmatpush3.bf16.msra.mxu1 %v1140_v2  ;;  %s1268_s13 = scalar_lea.vmem %s1320_s3, %s853_s21 }
  0x10   : > { %v1146_v4 = vld [vmem:[%s1215_s24] sm:$0xff]   ;;  %1072 = vmatprep.subr.bf16.mxu0 %v1141_v3  ;;  %1117 = vmatprep.subr.bf16.mxu1 %v1141_v3  ;;  %v1148_v10 = vld [vmem:[%s1215_s24 + $0x8] sm:$0xff]   ;;  %v1150_v12 = vld [vmem:[%s1215_s24 + $0x10] sm:$0xff]  }
  0x11   : > { %v1147_v5 = vld [vmem:[%s1215_s24 + $0x40] sm:$0xff]   ;;  %1082 = vmatprep.mubr.bf16.mxu0 %v1146_v4  ;;  %v1149_v11 = vld [vmem:[%s1215_s24 + $0x48] sm:$0xff]   ;;  %v1151_v13 = vld [vmem:[%s1215_s24 + $0x50] sm:$0xff]  }
  0x12   : > { %1098 = vmatprep.mubr.bf16.mxu1 %v1147_v5  ;;  %v1152_v14 = vld [vmem:[%s1215_s24 + $0x18] sm:$0xff]   ;;  %v1154_v16 = vld [vmem:[%s1215_s24 + $0x20] sm:$0xff]   ;;  %v1156_v18 = vld [vmem:[%s1215_s24 + $0x28] sm:$0xff]  }
  0x13   : > { %1073 = vmatpush3.bf16.msra.mxu0 %v1141_v3  ;;  %1125 = vmatpush3.bf16.msra.mxu1 %v1141_v3  ;;  %v1153_v15 = vld [vmem:[%s1215_s24 + $0x58] sm:$0xff]   ;;  %v1155_v17 = vld [vmem:[%s1215_s24 + $0x60] sm:$0xff]   ;;  %v1157_v19 = vld [vmem:[%s1215_s24 + $0x68] sm:$0xff]  }
  0x14   : > { %1074 = vmatprep.subr.bf16.mxu0 %v1142_v6  ;;  %1118 = vmatprep.subr.bf16.mxu1 %v1142_v6  ;;  %v1158_v20 = vld [vmem:[%s1215_s24 + $0x30] sm:$0xff]   ;;  %v1160_v22 = vld [vmem:[%s1215_s24 + $0x38] sm:$0xff]  }
  0x15   : > { %v1159_v21 = vld [vmem:[%s1215_s24 + $0x70] sm:$0xff]   ;;  %v1161_v23 = vld [vmem:[%s1215_s24 + $0x78] sm:$0xff]  }
  0x17   : > { %1075 = vmatpush3.bf16.msra.mxu0 %v1142_v6  ;;  %1126 = vmatpush3.bf16.msra.mxu1 %v1142_v6 }
  0x18   : > { %1076 = vmatprep.subr.bf16.mxu0 %v1143_v7  ;;  %1119 = vmatprep.subr.bf16.mxu1 %v1143_v7 }
  0x1b   : > { %1077 = vmatpush3.bf16.msra.mxu0 %v1143_v7  ;;  %1127 = vmatpush3.bf16.msra.mxu1 %v1143_v7 }
  0x1c   : > { %1078 = vmatprep.subr.bf16.mxu0 %v1144_v8  ;;  %1120 = vmatprep.subr.bf16.mxu1 %v1144_v8 }
  0x1f   : > { %1079 = vmatpush3.bf16.msra.mxu0 %v1144_v8  ;;  %1128 = vmatpush3.bf16.msra.mxu1 %v1144_v8 }
  0x20   : > { %1080 = vmatprep.subr.bf16.mxu0 %v1145_v9  ;;  %1121 = vmatprep.subr.bf16.mxu1 %v1145_v9 }
  0x23   : > { %1081 = vmatpush3.bf16.msra.mxu0 %v1145_v9  ;;  %1129 = vmatpush3.bf16.msra.mxu1 %v1145_v9 }
  0x26   : > { %1083 = vmatmul.mubr.bf16.vlgmr.msra.gmra.mrb[0].mxu0 %v1148_v10  ;;  %1099 = vmatmul.mubr.bf16.vlgmr.msra.gmra.mrb[0].mxu1 %v1149_v11 }
  0x27   : > { %1086 = vmatprep.mubr.bf16.mxu0 %v1150_v12  ;;  %1102 = vmatprep.mubr.bf16.mxu1 %v1151_v13 }
  0x2e   : > { %1087 = vmatmul.mubr.bf16.gmra.mrb[4].mxu0 %v1152_v14  ;;  %1103 = vmatmul.mubr.bf16.gmra.mrb[4].mxu1 %v1153_v15 }
  0x2f   : > { %1090 = vmatprep.mubr.bf16.mxu0 %v1154_v16  ;;  %1106 = vmatprep.mubr.bf16.mxu1 %v1155_v17 }
  0x36   : > { %1091 = vmatmul.mubr.bf16.gmra.mrb[8].mxu0 %v1156_v18  ;;  %1107 = vmatmul.mubr.bf16.gmra.mrb[8].mxu1 %v1157_v19 }
  0x37   : > { %1094 = vmatprep.mubr.bf16.mxu0 %v1158_v20  ;;  %1110 = vmatprep.mubr.bf16.mxu1 %v1159_v21 }
  0x3e   : > { %1095 = vmatmul.mubr.bf16.gmra.mrb[12].mxu0 %v1160_v22  ;;  %1111 = vmatmul.mubr.bf16.gmra.mrb[12].mxu1 %v1161_v23 }
  0xf9   : > { %v1084_v25 = vpop.f32.mrb[0].mxu0  ;;  %v1100_v26 = vpop.f32.mrb[0].mxu1 }
  0xfa   : > { %v417_v27 = vadd.f32 %v1084_v25, %v1251_v24  ;;  %v481_v28 = vadd.f32 %v1100_v26, %v1251_v24  ;;  %v408_v29 = vpop.f32.mrb[1].mxu0  ;;  %v472_v30 = vpop.f32.mrb[1].mxu1 }
  0xfb   : > { %v409_v31 = vadd.f32 %v1251_v24, %v408_v29  ;;  %v473_v32 = vadd.f32 %v1251_v24, %v472_v30  ;;  %v1085_v33 = vpop.f32.mrb[2].mxu0  ;;  %v1101_v34 = vpop.f32.mrb[2].mxu1 }
  0xfc   : > { %vm537_vm0 = vcmp.gt.f32.partialorder %v417_v27, 0.0  ;;  %v569_v35 = vmul.f32 0.2, %v417_v27  ;;  %vm553_vm1 = vcmp.gt.f32.partialorder %v481_v28, 0.0  ;;  %v585_v36 = vmul.f32 0.2, %v481_v28 }
  0xfd   : > { %vm535_vm2 = vcmp.gt.f32.partialorder %v409_v31, 0.0  ;;  %v567_v37 = vmul.f32 0.2, %v409_v31  ;;  %vm551_vm3 = vcmp.gt.f32.partialorder %v473_v32, 0.0  ;;  %v583_v38 = vmul.f32 0.2, %v473_v32 }
  0xfe   : > { %v420_v39 = vadd.f32 %v1085_v33, %v1251_v24  ;;  %v484_v40 = vadd.f32 %v1101_v34, %v1251_v24  ;;  %v411_v41 = vpop.f32.mrb[3].mxu0  ;;  %v475_v42 = vpop.f32.mrb[3].mxu1  ;;  %v601_v43 = vsel %vm537_vm0, %v417_v27, %v569_v35  ;;  %v617_v44 = vsel %vm553_vm1, %v481_v28, %v585_v36 }
  0xff   : > { %v412_v45 = vadd.f32 %v1251_v24, %v411_v41  ;;  %v476_v46 = vadd.f32 %v1251_v24, %v475_v42  ;;  %v599_v51 = vsel %vm535_vm2, %v409_v31, %v567_v37  ;;  %v615_v52 = vsel %vm551_vm3, %v473_v32, %v583_v38 }
 0x100   : > { %vm538_vm4 = vcmp.gt.f32.partialorder %v420_v39, 0.0  ;;  %v570_v47 = vmul.f32 0.2, %v420_v39  ;;  %vm554_vm5 = vcmp.gt.f32.partialorder %v484_v40, 0.0  ;;  %v586_v48 = vmul.f32 0.2, %v484_v40 }
 0x101   : > { %vm536_vm6 = vcmp.gt.f32.partialorder %v412_v45, 0.0  ;;  %v568_v49 = vmul.f32 0.2, %v412_v45  ;;  %vm552_vm7 = vcmp.gt.f32.partialorder %v476_v46, 0.0  ;;  %v584_v50 = vmul.f32 0.2, %v476_v46 }
 0x102   : > { %v602_v53 = vsel %vm538_vm4, %v420_v39, %v570_v47  ;;  %v618_v54 = vsel %vm554_vm5, %v484_v40, %v586_v48  ;;  %v1088_v55 = vpop.f32.mrb[4].mxu0  ;;  %v1104_v56 = vpop.f32.mrb[4].mxu1 }
 0x103   : > { %v955_v57 = vpack.c.bf16 %v602_v53, %v601_v43  ;;  %v995_v58 = vpack.c.bf16 %v618_v54, %v617_v44  ;;  %v600_v59 = vsel %vm536_vm6, %v412_v45, %v568_v49  ;;  %v616_v60 = vsel %vm552_vm7, %v476_v46, %v584_v50  ;;  %v424_v61 = vpop.f32.mrb[5].mxu0  ;;  %v488_v62 = vpop.f32.mrb[5].mxu1 }
 0x104   : > { %v950_v63 = vpack.c.bf16 %v600_v59, %v599_v51  ;;  %v990_v0 = vpack.c.bf16 %v616_v60, %v615_v52  ;;  %v433_v1 = vadd.f32 %v1088_v55, %v1251_v24  ;;  %v497_v2 = vadd.f32 %v1104_v56, %v1251_v24  ;;  %v1089_v3 = vpop.f32.mrb[6].mxu0  ;;  %v1105_v4 = vpop.f32.mrb[6].mxu1 }
 0x105   : > { %1027 = vst [vmem:[%s1268_s13 + $0x8] sm:$0xff] %v955_v57   ;;  %1035 = vst [vmem:[%s1268_s13 + $0x48] sm:$0xff] %v995_v58   ;;  %v425_v5 = vadd.f32 %v1251_v24, %v424_v61  ;;  %v489_v6 = vadd.f32 %v1251_v24, %v488_v62  ;;  %v436_v7 = vadd.f32 %v1089_v3, %v1251_v24  ;;  %v427_v9 = vpop.f32.mrb[7].mxu0  ;;  %v491_v10 = vpop.f32.mrb[7].mxu1 }
 0x106   : > { %v500_v8 = vadd.f32 %v1105_v4, %v1251_v24  ;;  %951 = vst [vmem:[%s1268_s13] sm:$0xff] %v950_v63   ;;  %1034 = vst [vmem:[%s1268_s13 + $0x40] sm:$0xff] %v990_v0   ;;  %vm541_vm8 = vcmp.gt.f32.partialorder %v433_v1, 0.0  ;;  %v573_v11 = vmul.f32 0.2, %v433_v1  ;;  %vm557_vm9 = vcmp.gt.f32.partialorder %v497_v2, 0.0 }
 0x107   : > { %v589_v12 = vmul.f32 0.2, %v497_v2  ;;  %vm539_vm10 = vcmp.gt.f32.partialorder %v425_v5, 0.0  ;;  %v571_v13 = vmul.f32 0.2, %v425_v5  ;;  %vm555_vm11 = vcmp.gt.f32.partialorder %v489_v6, 0.0 }
 0x108   : > { %v605_v14 = vsel %vm541_vm8, %v433_v1, %v573_v11  ;;  %v587_v15 = vmul.f32 0.2, %v489_v6  ;;  %vm542_vm12 = vcmp.gt.f32.partialorder %v436_v7, 0.0  ;;  %v574_v16 = vmul.f32 0.2, %v436_v7 }
 0x109   : > { %v621_v17 = vsel %vm557_vm9, %v497_v2, %v589_v12  ;;  %v603_v18 = vsel %vm539_vm10, %v425_v5, %v571_v13  ;;  %vm558_vm13 = vcmp.gt.f32.partialorder %v500_v8, 0.0  ;;  %v590_v19 = vmul.f32 0.2, %v500_v8  ;;  %v1092_v20 = vpop.f32.mrb[8].mxu0  ;;  %v1108_v21 = vpop.f32.mrb[8].mxu1 }
 0x10a   : > { %v606_v22 = vsel %vm542_vm12, %v436_v7, %v574_v16  ;;  %v428_v23 = vadd.f32 %v1251_v24, %v427_v9  ;;  %v492_v25 = vadd.f32 %v1251_v24, %v491_v10  ;;  %v449_v26 = vadd.f32 %v1092_v20, %v1251_v24  ;;  %v440_v27 = vpop.f32.mrb[9].mxu0  ;;  %v504_v28 = vpop.f32.mrb[9].mxu1 }
 0x10b   : > { %v965_v29 = vpack.c.bf16 %v606_v22, %v605_v14  ;;  %v622_v30 = vsel %vm558_vm13, %v500_v8, %v590_v19  ;;  %v513_v31 = vadd.f32 %v1108_v21, %v1251_v24  ;;  %v441_v32 = vadd.f32 %v1251_v24, %v440_v27  ;;  %v1093_v33 = vpop.f32.mrb[10].mxu0  ;;  %v1109_v34 = vpop.f32.mrb[10].mxu1 }
 0x10c   : > { %v1005_v35 = vpack.c.bf16 %v622_v30, %v621_v17  ;;  %vm540_vm14 = vcmp.gt.f32.partialorder %v428_v23, 0.0  ;;  %v572_v36 = vmul.f32 0.2, %v428_v23  ;;  %vm556_vm15 = vcmp.gt.f32.partialorder %v492_v25, 0.0  ;;  %v443_v37 = vpop.f32.mrb[11].mxu0  ;;  %v507_v38 = vpop.f32.mrb[11].mxu1 }
 0x10d   : > { %1029 = vst [vmem:[%s1268_s13 + $0x18] sm:$0xff] %v965_v29   ;;  %v588_v39 = vmul.f32 0.2, %v492_v25  ;;  %vm545_vm0 = vcmp.gt.f32.partialorder %v449_v26, 0.0  ;;  %v577_v40 = vmul.f32 0.2, %v449_v26  ;;  %v619_v41 = vsel %vm555_vm11, %v489_v6, %v587_v15 }
 0x10e   : > { %vm561_vm1 = vcmp.gt.f32.partialorder %v513_v31, 0.0  ;;  %1037 = vst [vmem:[%s1268_s13 + $0x58] sm:$0xff] %v1005_v35   ;;  %v604_v42 = vsel %vm540_vm14, %v428_v23, %v572_v36  ;;  %v593_v43 = vmul.f32 0.2, %v513_v31  ;;  %vm543_vm2 = vcmp.gt.f32.partialorder %v441_v32, 0.0 }
 0x10f   : > { %v960_v44 = vpack.c.bf16 %v604_v42, %v603_v18  ;;  %v620_v45 = vsel %vm556_vm15, %v492_v25, %v588_v39  ;;  %v575_v46 = vmul.f32 0.2, %v441_v32  ;;  %v505_v47 = vadd.f32 %v1251_v24, %v504_v28 }
 0x110   : > { %v1000_v48 = vpack.c.bf16 %v620_v45, %v619_v41  ;;  %v609_v49 = vsel %vm545_vm0, %v449_v26, %v577_v40  ;;  %v625_v50 = vsel %vm561_vm1, %v513_v31, %v593_v43  ;;  %v452_v51 = vadd.f32 %v1093_v33, %v1251_v24 }
 0x111   : > { %1028 = vst [vmem:[%s1268_s13 + $0x10] sm:$0xff] %v960_v44   ;;  %vm559_vm3 = vcmp.gt.f32.partialorder %v505_v47, 0.0  ;;  %v591_v52 = vmul.f32 0.2, %v505_v47  ;;  %v516_v53 = vadd.f32 %v1109_v34, %v1251_v24  ;;  %v444_v54 = vadd.f32 %v1251_v24, %v443_v37  ;;  %v1096_v55 = vpop.f32.mrb[12].mxu0  ;;  %v1112_v56 = vpop.f32.mrb[12].mxu1 }
 0x112   : > { %1036 = vst [vmem:[%s1268_s13 + $0x50] sm:$0xff] %v1000_v48   ;;  %vm546_vm4 = vcmp.gt.f32.partialorder %v452_v51, 0.0  ;;  %v578_v57 = vmul.f32 0.2, %v452_v51  ;;  %v508_v58 = vadd.f32 %v1251_v24, %v507_v38  ;;  %v465_v59 = vadd.f32 %v1096_v55, %v1251_v24  ;;  %v456_v60 = vpop.f32.mrb[13].mxu0  ;;  %v520_v61 = vpop.f32.mrb[13].mxu1 }
 0x113   : > { %v607_v62 = vsel %vm543_vm2, %v441_v32, %v575_v46  ;;  %vm562_vm5 = vcmp.gt.f32.partialorder %v516_v53, 0.0  ;;  %v594_v63 = vmul.f32 0.2, %v516_v53  ;;  %vm544_vm6 = vcmp.gt.f32.partialorder %v444_v54, 0.0  ;;  %v1097_v0 = vpop.f32.mrb[14].mxu0  ;;  %v1113_v1 = vpop.f32.mrb[14].mxu1 }
 0x114   : > { %v610_v2 = vsel %vm546_vm4, %v452_v51, %v578_v57  ;;  %v576_v3 = vmul.f32 0.2, %v444_v54  ;;  %vm560_vm7 = vcmp.gt.f32.partialorder %v508_v58, 0.0  ;;  %v592_v4 = vmul.f32 0.2, %v508_v58  ;;  %v459_v5 = vpop.f32.mrb[15].mxu0 }
 0x115   : > { %v623_v6 = vsel %vm559_vm3, %v505_v47, %v591_v52  ;;  %v975_v7 = vpack.c.bf16 %v610_v2, %v609_v49  ;;  %v626_v8 = vsel %vm562_vm5, %v516_v53, %v594_v63  ;;  %v581_v9 = vmul.f32 0.2, %v465_v59  ;;  %v523_v10 = vpop.f32.mrb[15].mxu1 }
 0x116   : > { %v1015_v11 = vpack.c.bf16 %v626_v8, %v625_v50  ;;  %v608_v12 = vsel %vm544_vm6, %v444_v54, %v576_v3  ;;  %v624_v13 = vsel %vm560_vm7, %v508_v58, %v592_v4  ;;  %v529_v14 = vadd.f32 %v1112_v56, %v1251_v24 }
 0x117   : > { %1031 = vst [vmem:[%s1268_s13 + $0x28] sm:$0xff] %v975_v7   ;;  %v970_v15 = vpack.c.bf16 %v608_v12, %v607_v62  ;;  %v1010_v16 = vpack.c.bf16 %v624_v13, %v623_v6  ;;  %vm549_vm8 = vcmp.gt.f32.partialorder %v465_v59, 0.0  ;;  %v457_v17 = vadd.f32 %v1251_v24, %v456_v60 }
 0x118   : > { %1039 = vst [vmem:[%s1268_s13 + $0x68] sm:$0xff] %v1015_v11   ;;  %vm565_vm9 = vcmp.gt.f32.partialorder %v529_v14, 0.0  ;;  %v597_v18 = vmul.f32 0.2, %v529_v14  ;;  %v521_v19 = vadd.f32 %v1251_v24, %v520_v61  ;;  %v468_v20 = vadd.f32 %v1097_v0, %v1251_v24 }
 0x119   : > { %1030 = vst [vmem:[%s1268_s13 + $0x20] sm:$0xff] %v970_v15   ;;  %1038 = vst [vmem:[%s1268_s13 + $0x60] sm:$0xff] %v1010_v16   ;;  %v579_v21 = vmul.f32 0.2, %v457_v17  ;;  %v532_v22 = vadd.f32 %v1113_v1, %v1251_v24  ;;  %v460_v23 = vadd.f32 %v1251_v24, %v459_v5  ;;  %v613_v25 = vsel %vm549_vm8, %v465_v59, %v581_v9 }
 0x11a   : > { %vm547_vm10 = vcmp.gt.f32.partialorder %v457_v17, 0.0  ;;  %vm550_vm11 = vcmp.gt.f32.partialorder %v468_v20, 0.0  ;;  %v629_v26 = vsel %vm565_vm9, %v529_v14, %v597_v18  ;;  %v582_v27 = vmul.f32 0.2, %v468_v20 }
 0x11b   : > { %vm566_vm12 = vcmp.gt.f32.partialorder %v532_v22, 0.0  ;;  %v598_v28 = vmul.f32 0.2, %v532_v22  ;;  %vm563_vm13 = vcmp.gt.f32.partialorder %v521_v19, 0.0  ;;  %vm548_vm14 = vcmp.gt.f32.partialorder %v460_v23, 0.0 }
 0x11c   : > { %v580_v29 = vmul.f32 0.2, %v460_v23  ;;  %v524_v30 = vadd.f32 %v1251_v24, %v523_v10  ;;  %v611_v31 = vsel %vm547_vm10, %v457_v17, %v579_v21  ;;  %v595_v32 = vmul.f32 0.2, %v521_v19 }
 0x11d   : > { %v614_v33 = vsel %vm550_vm11, %v468_v20, %v582_v27  ;;  %v630_v34 = vsel %vm566_vm12, %v532_v22, %v598_v28 }
 0x11e   : > { %v985_v35 = vpack.c.bf16 %v614_v33, %v613_v25  ;;  %v1025_v36 = vpack.c.bf16 %v630_v34, %v629_v26  ;;  %v612_v37 = vsel %vm548_vm14, %v460_v23, %v580_v29  ;;  %vm564_vm15 = vcmp.gt.f32.partialorder %v524_v30, 0.0 }
 0x11f   : > { %v980_v38 = vpack.c.bf16 %v612_v37, %v611_v31  ;;  %v596_v39 = vmul.f32 0.2, %v524_v30  ;;  %v627_v40 = vsel %vm563_vm13, %v521_v19, %v595_v32 }
 0x120   : > { %1033 = vst [vmem:[%s1268_s13 + $0x38] sm:$0xff] %v985_v35   ;;  %1041 = vst [vmem:[%s1268_s13 + $0x78] sm:$0xff] %v1025_v36  }
 0x121   : > { %1032 = vst [vmem:[%s1268_s13 + $0x30] sm:$0xff] %v980_v38   ;;  %v628_v41 = vsel %vm564_vm15, %v524_v30, %v596_v39 }
 0x122   : > { %v1020_v42 = vpack.c.bf16 %v628_v41, %v627_v40 }
 0x124   : > { %1040 = vst [vmem:[%s1268_s13 + $0x70] sm:$0xff] %v1020_v42  }
 0x125 PF: > { %s13_s12 = sadd.s32 1, %s1168_s12  }
 0x126   : > { %p10_p4 = scmp.ge.s32.totalorder %s13_s12, 4  }
 0x128   :  { %12 = sbr.rel (!%p10_p4) target bundleno = 1 (0x1), region = 62 }

// kernel: netD_forward.7
= control target key start
LH: loop header
LB: loop body
LE: loop exit
PB: predicated region body
PF: predicated region fallthrough
CT: control target
= control target key end

     0   :  { %s743_s12 = smov 0   ;;  %s831_s0 = inlined_call_operand.vmem [shape: bf16[128,256], index: 0, kind: input, shape index: {}]   ;;  %s832_s1 = inlined_call_operand.vmem [shape: bf16[256,128], index: 1, kind: input, shape index: {}]   ;;  %s833_s2 = inlined_call_operand.vmem [shape: f32[1,128], index: 2, kind: input, shape index: {}]   ;;  %s834_s3 = inlined_call_operand.vmem [shape: bf16[128,128], index: 3, kind: output, shape index: {}]  }
   0x1 LB: > { %s546_s13 = sadd.s32 4294967295, %s721_s12   ;;  %p550_p0 = scmp.ge.s32.totalorder %s721_s12, 1  ;;  %s721_s12 = sphi %s743_s12, %s13_s12  }
   0x2   : > { %p139_p1 = scmp.lt.s32.totalorder %s721_s12, 3 }
   0x4   : > { %p140_p2 = pnand %p550_p0, %p139_p1 }
   0x5   : > { %v687_v0 = vld [vmem:[%s832_s1 + $0x40] sm:$0xff] (!%p140_p2)   ;;  %s551_s16 = sshll.u32 (!%p140_p2), %s546_s13, 3  ;;  %v689_v2 = vld [vmem:[%s832_s1 + $0x48] sm:$0xff] (!%p140_p2)   ;;  %v691_v4 = vld [vmem:[%s832_s1 + $0x50] sm:$0xff] (!%p140_p2)  }
   0x6   : > { %143 = sbr.rel (%p140_p2) target bundleno = 272 (0x110), region = 32  ;;  %v688_v1 = vld [vmem:[%s832_s1] sm:$0xff] (!%p140_p2)   ;;  %623 = vmatprep.subr.bf16.mxu0 (!%p140_p2), %v687_v0  ;;  %663 = vmatprep.subr.bf16.mxu1 (!%p140_p2), %v687_v0  ;;  %v690_v3 = vld [vmem:[%s832_s1 + $0x8] sm:$0xff] (!%p140_p2)   ;;  %p165_p3 = scmp.lt.s32.totalorder (!%p140_p2), %s551_s16, 15  ;;  %v692_v5 = vld [vmem:[%s832_s1 + $0x10] sm:$0xff] (!%p140_p2)  }
   0x7   : > { %624 = vmatpush3.bf16.msra.mxu0 (!%p140_p2), %v688_v1  ;;  %671 = vmatpush3.bf16.msra.mxu1 (!%p140_p2), %v688_v1  ;;  %v693_v6 = vld [vmem:[%s832_s1 + $0x58] sm:$0xff] (!%p140_p2)   ;;  %v695_v8 = vld [vmem:[%s832_s1 + $0x60] sm:$0xff] (!%p140_p2)   ;;  %v697_v10 = vld [vmem:[%s832_s1 + $0x68] sm:$0xff] (!%p140_p2)  }
   0x8   : > { %625 = vmatprep.subr.bf16.mxu0 (!%p140_p2), %v689_v2  ;;  %664 = vmatprep.subr.bf16.mxu1 (!%p140_p2), %v689_v2  ;;  %v694_v7 = vld [vmem:[%s832_s1 + $0x18] sm:$0xff] (!%p140_p2)   ;;  %v696_v9 = vld [vmem:[%s832_s1 + $0x20] sm:$0xff] (!%p140_p2)   ;;  %v698_v13 = vld [vmem:[%s832_s1 + $0x28] sm:$0xff] (!%p140_p2)  }
   0x9   : > { %v699_v14 = vld [vmem:[%s832_s1 + $0x70] sm:$0xff] (!%p140_p2)   ;;  %v701_v16 = vld [vmem:[%s832_s1 + $0x78] sm:$0xff] (!%p140_p2)   ;;  %v556_v26 = vld [vmem:[%s833_s2] ss:$0 sm:$0xff] (!%p140_p2) }
   0xa   : > { %v700_v15 = vld [vmem:[%s832_s1 + $0x30] sm:$0xff] (!%p140_p2)   ;;  %v702_v17 = vld [vmem:[%s832_s1 + $0x38] sm:$0xff] (!%p140_p2)  }
   0xb   : > { %626 = vmatpush3.bf16.msra.mxu0 (!%p140_p2), %v690_v3  ;;  %672 = vmatpush3.bf16.msra.mxu1 (!%p140_p2), %v690_v3 }
   0xc   : > { %627 = vmatprep.subr.bf16.mxu0 (!%p140_p2), %v691_v4  ;;  %665 = vmatprep.subr.bf16.mxu1 (!%p140_p2), %v691_v4 }
   0xd   : > { %s836_s16 = smov (!%p165_p3, %s551_s16), 15 }
   0xe   : > { %s591_s4 = sshll.u32 %s836_s16, 3  ;;  %s555_s28 = sshll.u32 %s836_s16, 2 }
   0xf   : > { %628 = vmatpush3.bf16.msra.mxu0 %v692_v5  ;;  %673 = vmatpush3.bf16.msra.mxu1 %v692_v5  ;;  %s784_s9 = scalar_lea.vmem %s831_s0, %s591_s4  ;;  %s822_s4 = scalar_lea.vmem %s834_s3, %s555_s28 }
  0x10   : > { %629 = vmatprep.subr.bf16.mxu0 %v693_v6  ;;  %666 = vmatprep.subr.bf16.mxu1 %v693_v6  ;;  %v705_v11 = vld [vmem:[%s784_s9 + $0x4] ss:$8 sps:$4 sm:$0xff]   ;;  %v703_v18 = vld [vmem:[%s784_s9] ss:$8 sps:$4 sm:$0xff]   ;;  %v709_v20 = vld [vmem:[%s784_s9 + $0x14] ss:$8 sps:$4 sm:$0xff]  }
  0x11   : > { %v708_v12 = vld [vmem:[%s784_s9 + $0x24] ss:$8 sps:$4 sm:$0xff]   ;;  %393 = vmatprep.mubr.bf16.mxu0 %v705_v11  ;;  %v706_v19 = vld [vmem:[%s784_s9 + $0x20] ss:$8 sps:$4 sm:$0xff]   ;;  %v711_v21 = vld [vmem:[%s784_s9 + $0x34] ss:$8 sps:$4 sm:$0xff]  }
  0x12   : > { %409 = vmatprep.mubr.bf16.mxu1 %v708_v12  ;;  %v713_v22 = vld [vmem:[%s784_s9 + $0x10] ss:$8 sps:$4 sm:$0xff]  }
  0x13   : > { %630 = vmatpush3.bf16.msra.mxu0 %v694_v7  ;;  %674 = vmatpush3.bf16.msra.mxu1 %v694_v7  ;;  %v714_v23 = vld [vmem:[%s784_s9 + $0x30] ss:$8 sps:$4 sm:$0xff]  }
  0x14   : > { %631 = vmatprep.subr.bf16.mxu0 %v695_v8  ;;  %667 = vmatprep.subr.bf16.mxu1 %v695_v8 }
  0x17   : > { %632 = vmatpush3.bf16.msra.mxu0 %v696_v9  ;;  %675 = vmatpush3.bf16.msra.mxu1 %v696_v9 }
  0x18   : > { %633 = vmatprep.subr.bf16.mxu0 %v697_v10  ;;  %668 = vmatprep.subr.bf16.mxu1 %v697_v10 }
  0x1b   : > { %634 = vmatpush3.bf16.msra.mxu0 %v698_v13  ;;  %676 = vmatpush3.bf16.msra.mxu1 %v698_v13 }
  0x1c   : > { %635 = vmatprep.subr.bf16.mxu0 %v699_v14  ;;  %669 = vmatprep.subr.bf16.mxu1 %v699_v14 }
  0x1f   : > { %636 = vmatpush3.bf16.msra.mxu0 %v700_v15  ;;  %677 = vmatpush3.bf16.msra.mxu1 %v700_v15 }
  0x20   : > { %637 = vmatprep.subr.bf16.mxu0 %v701_v16  ;;  %670 = vmatprep.subr.bf16.mxu1 %v701_v16 }
  0x23   : > { %638 = vmatpush3.bf16.msra.mxu0 %v702_v17  ;;  %678 = vmatpush3.bf16.msra.mxu1 %v702_v17 }
  0x26   : > { %394 = vmatmul.mubr.bf16.vlgmr.msra.gmra.mrb[0].mxu0 %v703_v18  ;;  %410 = vmatmul.mubr.bf16.vlgmr.msra.gmra.mrb[0].mxu1 %v706_v19 }
  0x27   : > { %401 = vmatprep.mubr.bf16.mxu0 %v709_v20  ;;  %417 = vmatprep.mubr.bf16.mxu1 %v711_v21 }
  0x2e   : > { %402 = vmatmul.mubr.bf16.gmra.mrb[4].mxu0 %v713_v22  ;;  %418 = vmatmul.mubr.bf16.gmra.mrb[4].mxu1 %v714_v23 }
  0xf9   : > { %v639_v24 = vpop.f32.mrb[0].mxu0  ;;  %v651_v25 = vpop.f32.mrb[0].mxu1 }
  0xfa   : > { %v640_v27 = vpop.f32.mrb[1].mxu0  ;;  %v652_v28 = vpop.f32.mrb[1].mxu1 }
  0xfb   : > { %v641_v29 = vadd.f32 %v640_v27, %v639_v24  ;;  %v653_v30 = vadd.f32 %v652_v28, %v651_v25  ;;  %v642_v31 = vpop.f32.mrb[2].mxu0  ;;  %v654_v32 = vpop.f32.mrb[2].mxu1 }
  0xfc   : > { %v643_v33 = vpop.f32.mrb[3].mxu0  ;;  %v655_v34 = vpop.f32.mrb[3].mxu1 }
  0xfd   : > { %v396_v35 = vadd.f32 %v641_v29, %v556_v26  ;;  %v412_v36 = vadd.f32 %v653_v30, %v556_v26  ;;  %v644_v37 = vadd.f32 %v643_v33, %v642_v31  ;;  %v656_v38 = vadd.f32 %v655_v34, %v654_v32 }
  0xff   : > { %v434_v39 = vmul.f32 0.2, %v396_v35  ;;  %v438_v40 = vmul.f32 0.2, %v412_v36  ;;  %vm426_vm0 = vcmp.gt.f32.partialorder %v396_v35, 0.0  ;;  %vm430_vm1 = vcmp.gt.f32.partialorder %v412_v36, 0.0 }
 0x100   : > { %v399_v41 = vadd.f32 %v644_v37, %v556_v26  ;;  %v415_v42 = vadd.f32 %v656_v38, %v556_v26 }
 0x101   : > { %v645_v43 = vpop.f32.mrb[4].mxu0  ;;  %v657_v44 = vpop.f32.mrb[4].mxu1  ;;  %v442_v47 = vsel %vm426_vm0, %v396_v35, %v434_v39  ;;  %v446_v48 = vsel %vm430_vm1, %v412_v36, %v438_v40 }
 0x102   : > { %vm427_vm2 = vcmp.gt.f32.partialorder %v399_v41, 0.0  ;;  %v435_v45 = vmul.f32 0.2, %v399_v41  ;;  %vm431_vm3 = vcmp.gt.f32.partialorder %v415_v42, 0.0  ;;  %v439_v46 = vmul.f32 0.2, %v415_v42 }
 0x103   : > { %v646_v49 = vpop.f32.mrb[5].mxu0  ;;  %v658_v50 = vpop.f32.mrb[5].mxu1 }
 0x104   : > { %v443_v51 = vsel %vm427_vm2, %v399_v41, %v435_v45  ;;  %v447_v52 = vsel %vm431_vm3, %v415_v42, %v439_v46  ;;  %v647_v53 = vadd.f32 %v646_v49, %v645_v43  ;;  %v659_v54 = vadd.f32 %v658_v50, %v657_v44  ;;  %v648_v55 = vpop.f32.mrb[6].mxu0  ;;  %v660_v56 = vpop.f32.mrb[6].mxu1 }
 0x105   : > { %v603_v57 = vpack.c.bf16 %v443_v51, %v442_v47  ;;  %v613_v58 = vpack.c.bf16 %v447_v52, %v446_v48  ;;  %v649_v59 = vpop.f32.mrb[7].mxu0  ;;  %v661_v60 = vpop.f32.mrb[7].mxu1 }
 0x106   : > { %v404_v61 = vadd.f32 %v647_v53, %v556_v26  ;;  %v420_v62 = vadd.f32 %v659_v54, %v556_v26  ;;  %v650_v63 = vadd.f32 %v649_v59, %v648_v55  ;;  %v662_v0 = vadd.f32 %v661_v60, %v660_v56 }
 0x107   : > { %604 = vst [vmem:[%s822_s4] sm:$0xff] %v603_v57   ;;  %621 = vst [vmem:[%s822_s4 + $0x10] sm:$0xff] %v613_v58  }
 0x108   : > { %v436_v1 = vmul.f32 0.2, %v404_v61  ;;  %v440_v2 = vmul.f32 0.2, %v420_v62  ;;  %v407_v3 = vadd.f32 %v650_v63, %v556_v26  ;;  %v423_v4 = vadd.f32 %v662_v0, %v556_v26 }
 0x109   : > { %vm428_vm4 = vcmp.gt.f32.partialorder %v404_v61, 0.0  ;;  %vm432_vm5 = vcmp.gt.f32.partialorder %v420_v62, 0.0 }
 0x10a   : > { %vm429_vm6 = vcmp.gt.f32.partialorder %v407_v3, 0.0  ;;  %v437_v5 = vmul.f32 0.2, %v407_v3  ;;  %vm433_vm7 = vcmp.gt.f32.partialorder %v423_v4, 0.0  ;;  %v441_v6 = vmul.f32 0.2, %v423_v4 }
 0x10b   : > { %v444_v7 = vsel %vm428_vm4, %v404_v61, %v436_v1  ;;  %v448_v8 = vsel %vm432_vm5, %v420_v62, %v440_v2 }
 0x10c   : > { %v445_v9 = vsel %vm429_vm6, %v407_v3, %v437_v5  ;;  %v449_v10 = vsel %vm433_vm7, %v423_v4, %v441_v6 }
 0x10d   : > { %v608_v11 = vpack.c.bf16 %v445_v9, %v444_v7  ;;  %v618_v12 = vpack.c.bf16 %v449_v10, %v448_v8 }
 0x10f   : > { %620 = vst [vmem:[%s822_s4 + $0x8] sm:$0xff] %v608_v11   ;;  %622 = vst [vmem:[%s822_s4 + $0x18] sm:$0xff] %v618_v12  }
 0x110 PF: > { %s13_s12 = sadd.s32 1, %s721_s12  }
 0x111   : > { %p10_p4 = scmp.ge.s32.totalorder %s13_s12, 4  }
 0x113   :  { %12 = sbr.rel (!%p10_p4) target bundleno = 1 (0x1), region = 62 }

// kernel: netD_forward.8
= control target key start
LH: loop header
LB: loop body
LE: loop exit
PB: predicated region body
PF: predicated region fallthrough
CT: control target
= control target key end

     0   :  { %s796_s12 = smov 0   ;;  %s918_s0 = inlined_call_operand.vmem [shape: bf16[32,512], index: 0, kind: input, shape index: {}]   ;;  %s919_s1 = inlined_call_operand.vmem [shape: bf16[512,128], index: 1, kind: input, shape index: {}]   ;;  %s920_s2 = inlined_call_operand.vmem [shape: f32[1,128], index: 2, kind: input, shape index: {}]   ;;  %s921_s3 = inlined_call_operand.vmem [shape: bf16[32,128], index: 3, kind: output, shape index: {}]  }
   0x1 LB: > { %s619_s13 = sadd.s32 4294967295, %s774_s12   ;;  %p623_p0 = scmp.ge.s32.totalorder %s774_s12, 1  ;;  %s774_s12 = sphi %s796_s12, %s13_s12  }
   0x2   : > { %p139_p1 = scmp.lt.s32.totalorder %s774_s12, 3 }
   0x4   : > { %p140_p2 = pnand %p623_p0, %p139_p1 }
   0x5   : > { %v730_v0 = vld [vmem:[%s919_s1 + $0x40] sm:$0xff] (!%p140_p2)   ;;  %v734_v4 = vld [vmem:[%s919_s1 + $0x48] sm:$0xff] (!%p140_p2)   ;;  %v738_v8 = vld [vmem:[%s919_s1 + $0x50] sm:$0xff] (!%p140_p2)   ;;  %s624_s21 = sshll.u32 (!%p140_p2), %s619_s13, 1 }
   0x6   : > { %143 = sbr.rel (%p140_p2) target bundleno = 266 (0x10a), region = 32  ;;  %v731_v1 = vld [vmem:[%s919_s1 + $0xc0] sm:$0xff] (!%p140_p2)   ;;  %678 = vmatprep.subr.bf16.mxu0 (!%p140_p2), %v730_v0  ;;  %v735_v5 = vld [vmem:[%s919_s1 + $0xc8] sm:$0xff] (!%p140_p2)   ;;  %v739_v9 = vld [vmem:[%s919_s1 + $0xd0] sm:$0xff] (!%p140_p2)   ;;  %p165_p3 = scmp.lt.s32.totalorder (!%p140_p2), %s624_s21, 3 }
   0x7   : > { %v732_v2 = vld [vmem:[%s919_s1] sm:$0xff] (!%p140_p2)   ;;  %700 = vmatprep.subr.bf16.mxu1 (!%p140_p2), %v731_v1  ;;  %v736_v6 = vld [vmem:[%s919_s1 + $0x8] sm:$0xff] (!%p140_p2)   ;;  %v740_v10 = vld [vmem:[%s919_s1 + $0x10] sm:$0xff] (!%p140_p2)  }
   0x8   : > { %v733_v3 = vld [vmem:[%s919_s1 + $0x80] sm:$0xff] (!%p140_p2)   ;;  %679 = vmatpush3.bf16.msra.mxu0 (!%p140_p2), %v732_v2  ;;  %v737_v7 = vld [vmem:[%s919_s1 + $0x88] sm:$0xff] (!%p140_p2)   ;;  %v741_v11 = vld [vmem:[%s919_s1 + $0x90] sm:$0xff] (!%p140_p2)  }
   0x9   : > { %701 = vmatpush3.bf16.msra.mxu1 (!%p140_p2), %v733_v3  ;;  %680 = vmatprep.subr.bf16.mxu0 (!%p140_p2), %v734_v4  ;;  %v742_v12 = vld [vmem:[%s919_s1 + $0x58] sm:$0xff] (!%p140_p2)   ;;  %v746_v16 = vld [vmem:[%s919_s1 + $0x60] sm:$0xff] (!%p140_p2)   ;;  %v750_v20 = vld [vmem:[%s919_s1 + $0x68] sm:$0xff] (!%p140_p2)  }
   0xa   : > { %702 = vmatprep.subr.bf16.mxu1 (!%p140_p2), %v735_v5  ;;  %v743_v13 = vld [vmem:[%s919_s1 + $0xd8] sm:$0xff] (!%p140_p2)   ;;  %v747_v17 = vld [vmem:[%s919_s1 + $0xe0] sm:$0xff] (!%p140_p2)   ;;  %v751_v21 = vld [vmem:[%s919_s1 + $0xe8] sm:$0xff] (!%p140_p2)  }
   0xb   : > { %v744_v14 = vld [vmem:[%s919_s1 + $0x18] sm:$0xff] (!%p140_p2)   ;;  %v748_v18 = vld [vmem:[%s919_s1 + $0x20] sm:$0xff] (!%p140_p2)   ;;  %v752_v22 = vld [vmem:[%s919_s1 + $0x28] sm:$0xff] (!%p140_p2)  }
   0xc   : > { %681 = vmatpush3.bf16.msra.mxu0 (!%p140_p2), %v736_v6  ;;  %v745_v15 = vld [vmem:[%s919_s1 + $0x98] sm:$0xff] (!%p140_p2)   ;;  %v749_v19 = vld [vmem:[%s919_s1 + $0xa0] sm:$0xff] (!%p140_p2)   ;;  %v753_v23 = vld [vmem:[%s919_s1 + $0xa8] sm:$0xff] (!%p140_p2)  }
   0xd   : > { %703 = vmatpush3.bf16.msra.mxu1 %v737_v7  ;;  %682 = vmatprep.subr.bf16.mxu0 %v738_v8  ;;  %s923_s21 = smov (!%p165_p3, %s624_s21), 3  ;;  %v754_v24 = vld [vmem:[%s919_s1 + $0x70] sm:$0xff]   ;;  %v758_v28 = vld [vmem:[%s919_s1 + $0x78] sm:$0xff]   ;;  %v629_v38 = vld [vmem:[%s920_s2] ss:$0 sm:$0xff] }
   0xe   : > { %704 = vmatprep.subr.bf16.mxu1 %v739_v9  ;;  %v755_v25 = vld [vmem:[%s919_s1 + $0xf0] sm:$0xff]   ;;  %s670_s18 = sshll.u32 %s923_s21, 4  ;;  %v759_v29 = vld [vmem:[%s919_s1 + $0xf8] sm:$0xff]   ;;  %s628_s7 = sshll.u32 %s923_s21, 2 }
   0xf   : > { %v756_v26 = vld [vmem:[%s919_s1 + $0x30] sm:$0xff]   ;;  %s169_s28 = scalar_lea.vmem %s918_s0, %s670_s18  ;;  %v760_v30 = vld [vmem:[%s919_s1 + $0x38] sm:$0xff]   ;;  %s175_s10 = scalar_lea.vmem %s921_s3, %s628_s7 }
  0x10   : > { %683 = vmatpush3.bf16.msra.mxu0 %v740_v10  ;;  %v757_v27 = vld [vmem:[%s919_s1 + $0xb0] sm:$0xff]   ;;  %v761_v31 = vld [vmem:[%s919_s1 + $0xb8] sm:$0xff]  }
  0x11   : > { %705 = vmatpush3.bf16.msra.mxu1 %v741_v11  ;;  %684 = vmatprep.subr.bf16.mxu0 %v742_v12  ;;  %v762_v32 = vld [vmem:[%s169_s28] ss:$16 sps:$4 sm:$0xff]   ;;  %v764_v33 = vld [vmem:[%s169_s28 + $0x4] ss:$16 sps:$4 sm:$0xff]   ;;  %v765_v34 = vld [vmem:[%s169_s28 + $0x8] ss:$16 sps:$4 sm:$0xff]  }
  0x12   : > { %706 = vmatprep.subr.bf16.mxu1 %v743_v13  ;;  %v767_v35 = vld [vmem:[%s169_s28 + $0xc] ss:$16 sps:$4 sm:$0xff]   ;;  %497 = vmatprep.mubr.bf16.mxu0 %v764_v33 }
  0x13   : > { %538 = vmatprep.mubr.bf16.mxu1 %v767_v35 }
  0x14   : > { %685 = vmatpush3.bf16.msra.mxu0 %v744_v14 }
  0x15   : > { %707 = vmatpush3.bf16.msra.mxu1 %v745_v15  ;;  %686 = vmatprep.subr.bf16.mxu0 %v746_v16 }
  0x16   : > { %708 = vmatprep.subr.bf16.mxu1 %v747_v17 }
  0x18   : > { %687 = vmatpush3.bf16.msra.mxu0 %v748_v18 }
  0x19   : > { %709 = vmatpush3.bf16.msra.mxu1 %v749_v19  ;;  %688 = vmatprep.subr.bf16.mxu0 %v750_v20 }
  0x1a   : > { %710 = vmatprep.subr.bf16.mxu1 %v751_v21 }
  0x1c   : > { %689 = vmatpush3.bf16.msra.mxu0 %v752_v22 }
  0x1d   : > { %711 = vmatpush3.bf16.msra.mxu1 %v753_v23  ;;  %690 = vmatprep.subr.bf16.mxu0 %v754_v24 }
  0x1e   : > { %712 = vmatprep.subr.bf16.mxu1 %v755_v25 }
  0x20   : > { %691 = vmatpush3.bf16.msra.mxu0 %v756_v26 }
  0x21   : > { %713 = vmatpush3.bf16.msra.mxu1 %v757_v27  ;;  %692 = vmatprep.subr.bf16.mxu0 %v758_v28 }
  0x22   : > { %714 = vmatprep.subr.bf16.mxu1 %v759_v29 }
  0x24   : > { %693 = vmatpush3.bf16.msra.mxu0 %v760_v30 }
  0x25   : > { %715 = vmatpush3.bf16.msra.mxu1 %v761_v31 }
  0x27   : > { %498 = vmatmul.mubr.bf16.vlgmr.msra.gmra.mrb[0].mxu0 %v762_v32 }
  0x28   : > { %539 = vmatmul.mubr.bf16.vlgmr.msra.gmra.mrb[0].mxu1 %v765_v34 }
  0xfa   : > { %v694_v36 = vpop.f32.mrb[0].mxu0 }
  0xfb   : > { %v716_v37 = vpop.f32.mrb[0].mxu1  ;;  %v695_v39 = vpop.f32.mrb[1].mxu0 }
  0xfc   : > { %v696_v40 = vadd.f32 %v695_v39, %v694_v36  ;;  %v717_v41 = vpop.f32.mrb[1].mxu1  ;;  %v697_v42 = vpop.f32.mrb[2].mxu0 }
  0xfd   : > { %v718_v43 = vadd.f32 %v717_v41, %v716_v37  ;;  %v719_v44 = vpop.f32.mrb[2].mxu1  ;;  %v698_v45 = vpop.f32.mrb[3].mxu0 }
  0xfe   : > { %v500_v46 = vadd.f32 %v696_v40, %v629_v38  ;;  %v699_v47 = vadd.f32 %v698_v45, %v697_v42  ;;  %v720_v48 = vpop.f32.mrb[3].mxu1 }
  0xff   : > { %v721_v49 = vadd.f32 %v720_v48, %v719_v44 }
 0x100   : > { %v541_v50 = vadd.f32 %v718_v43, %v500_v46  ;;  %v503_v51 = vadd.f32 %v699_v47, %v629_v38 }
 0x102   : > { %v549_v52 = vmul.f32 0.2, %v541_v50  ;;  %v544_v53 = vadd.f32 %v721_v49, %v503_v51  ;;  %vm547_vm0 = vcmp.gt.f32.partialorder %v541_v50, 0.0 }
 0x104   : > { %vm548_vm1 = vcmp.gt.f32.partialorder %v544_v53, 0.0  ;;  %v550_v54 = vmul.f32 0.2, %v544_v53  ;;  %v551_v55 = vsel %vm547_vm0, %v541_v50, %v549_v52 }
 0x106   : > { %v552_v56 = vsel %vm548_vm1, %v544_v53, %v550_v54 }
 0x107   : > { %v676_v57 = vpack.c.bf16 %v552_v56, %v551_v55 }
 0x109   : > { %677 = vst [vmem:[%s175_s10] sm:$0xff] %v676_v57  }
 0x10a PF: > { %s13_s12 = sadd.s32 1, %s774_s12  }
 0x10b   : > { %p10_p4 = scmp.ge.s32.totalorder %s13_s12, 4  }
 0x10d   :  { %12 = sbr.rel (!%p10_p4) target bundleno = 1 (0x1), region = 62 }

// kernel: netD_forward.9
= control target key start
LH: loop header
LB: loop body
LE: loop exit
PB: predicated region body
PF: predicated region fallthrough
CT: control target
= control target key end

     0   :  { %v157_v28 = vlaneseq  ;;  %v1013_v36 = vmov 1966171168   ;;  %s1258_s0 = inlined_call_operand.vmem [shape: bf16[2,1024], index: 0, kind: input, shape index: {}]   ;;  %s1259_s1 = inlined_call_operand.vmem [shape: bf16[1024,128], index: 1, kind: input, shape index: {}]   ;;  %s1260_s2 = inlined_call_operand.vmem [shape: f32[1,128], index: 2, kind: input, shape index: {}]   ;;  %s1261_s3 = inlined_call_operand.hbm [shape: f32[2,128], index: 3, kind: output, shape index: {}]  }
   0x1   :  { %v924_v0 = vld [vmem:[%s1259_s1 + $0x40] sm:$0xff]   ;;  %v928_v4 = vld [vmem:[%s1259_s1 + $0x48] sm:$0xff]   ;;  %v932_v8 = vld [vmem:[%s1259_s1 + $0x50] sm:$0xff]   ;;  %v155_v37 = vunpack.c.l.s4 %v1013_v36 }
   0x2   :  { %v925_v1 = vld [vmem:[%s1259_s1 + $0xc0] sm:$0xff]   ;;  %834 = vmatprep.subr.bf16.mxu0 %v924_v0  ;;  %v929_v5 = vld [vmem:[%s1259_s1 + $0xc8] sm:$0xff]   ;;  %v933_v9 = vld [vmem:[%s1259_s1 + $0xd0] sm:$0xff]   ;;  %v158_v33 = vshrl.u32 %v157_v28, 7 }
   0x3   :  { %v926_v2 = vld [vmem:[%s1259_s1] sm:$0xff]   ;;  %856 = vmatprep.subr.bf16.mxu1 %v925_v1  ;;  %v930_v6 = vld [vmem:[%s1259_s1 + $0x8] sm:$0xff]   ;;  %v934_v10 = vld [vmem:[%s1259_s1 + $0x10] sm:$0xff]   ;;  %v156_v40 = vunpack.c.0.s8 %v155_v37 }
   0x4   :  { %v927_v3 = vld [vmem:[%s1259_s1 + $0x80] sm:$0xff]   ;;  %835 = vmatpush3.bf16.msra.mxu0 %v926_v2  ;;  %v931_v7 = vld [vmem:[%s1259_s1 + $0x88] sm:$0xff]   ;;  %v935_v11 = vld [vmem:[%s1259_s1 + $0x90] sm:$0xff]  }
   0x5   :  { %857 = vmatpush3.bf16.msra.mxu1 %v927_v3  ;;  %836 = vmatprep.subr.bf16.mxu0 %v928_v4  ;;  %v936_v12 = vld [vmem:[%s1259_s1 + $0x58] sm:$0xff]   ;;  %v940_v16 = vld [vmem:[%s1259_s1 + $0x60] sm:$0xff]   ;;  %v944_v20 = vld [vmem:[%s1259_s1 + $0x68] sm:$0xff]   ;;  %v1140_v41 = vsub.s32 %v156_v40, %v158_v33 }
   0x6   :  { %858 = vmatprep.subr.bf16.mxu1 %v929_v5  ;;  %v937_v13 = vld [vmem:[%s1259_s1 + $0xd8] sm:$0xff]   ;;  %v941_v17 = vld [vmem:[%s1259_s1 + $0xe0] sm:$0xff]   ;;  %v945_v21 = vld [vmem:[%s1259_s1 + $0xe8] sm:$0xff]  }
   0x7   :  { %v938_v14 = vld [vmem:[%s1259_s1 + $0x18] sm:$0xff]   ;;  %v942_v18 = vld [vmem:[%s1259_s1 + $0x20] sm:$0xff]   ;;  %v946_v22 = vld [vmem:[%s1259_s1 + $0x28] sm:$0xff]  }
   0x8   :  { %837 = vmatpush3.bf16.msra.mxu0 %v930_v6  ;;  %v939_v15 = vld [vmem:[%s1259_s1 + $0x98] sm:$0xff]   ;;  %v943_v19 = vld [vmem:[%s1259_s1 + $0xa0] sm:$0xff]   ;;  %v947_v23 = vld [vmem:[%s1259_s1 + $0xa8] sm:$0xff]  }
   0x9   :  { %859 = vmatpush3.bf16.msra.mxu1 %v931_v7  ;;  %838 = vmatprep.subr.bf16.mxu0 %v932_v8  ;;  %v948_v24 = vld [vmem:[%s1259_s1 + $0x70] sm:$0xff]   ;;  %v952_v29 = vld [vmem:[%s1259_s1 + $0x78] sm:$0xff]   ;;  %v16_v34 = vld [vmem:[%s1258_s0] sm:$0xff] }
   0xa   :  { %860 = vmatprep.subr.bf16.mxu1 %v933_v9  ;;  %v949_v25 = vld [vmem:[%s1259_s1 + $0xf0] sm:$0xff]   ;;  %v953_v30 = vld [vmem:[%s1259_s1 + $0xf8] sm:$0xff]   ;;  %v957_v35 = vld [vmem:[%s1259_s1 + $0x140] sm:$0xff]   ;;  %v153_v39 = vcombine.high %v16_v34, %v16_v34  ;;  %v160_v42 = vrot.slane %v16_v34, %v1140_v41 }
   0xb   :  { %v950_v26 = vld [vmem:[%s1259_s1 + $0x30] sm:$0xff]   ;;  %v954_v31 = vld [vmem:[%s1259_s1 + $0x38] sm:$0xff]   ;;  %v958_v38 = vld [vmem:[%s1259_s1 + $0x1c0] sm:$0xff]  }
   0xc   :  { %839 = vmatpush3.bf16.msra.mxu0 %v934_v10  ;;  %v951_v27 = vld [vmem:[%s1259_s1 + $0xb0] sm:$0xff]   ;;  %v955_v32 = vld [vmem:[%s1259_s1 + $0xb8] sm:$0xff]   ;;  %v1144_v43 = vrot.slane %v153_v39, %v1140_v41  ;;  %v168_v44 = vcombine.high %v160_v42, %v160_v42  ;;  %v176_v45 = vrot.slane %v160_v42, %v1140_v41  ;;  %v959_v48 = vld [vmem:[%s1259_s1 + $0x100] sm:$0xff]  }
   0xd   :  { %861 = vmatpush3.bf16.msra.mxu1 %v935_v11  ;;  %840 = vmatprep.subr.bf16.mxu0 %v936_v12  ;;  %v961_v51 = vld [vmem:[%s1259_s1 + $0x148] sm:$0xff]   ;;  %v960_v53 = vld [vmem:[%s1259_s1 + $0x180] sm:$0xff]   ;;  %v965_v57 = vld [vmem:[%s1259_s1 + $0x150] sm:$0xff]  }
   0xe   :  { %862 = vmatprep.subr.bf16.mxu1 %v937_v13  ;;  %v169_v46 = vcombine.high %v1144_v43, %v1144_v43  ;;  %v190_v47 = vrot.slane %v168_v44, %v1140_v41  ;;  %v198_v50 = vcombine.high %v176_v45, %v176_v45  ;;  %v962_v54 = vld [vmem:[%s1259_s1 + $0x1c8] sm:$0xff]   ;;  %v966_v59 = vld [vmem:[%s1259_s1 + $0x1d0] sm:$0xff]   ;;  %v969_v61 = vld [vmem:[%s1259_s1 + $0x158] sm:$0xff]  }
   0xf   :  { %v963_v56 = vld [vmem:[%s1259_s1 + $0x108] sm:$0xff]   ;;  %v967_v60 = vld [vmem:[%s1259_s1 + $0x110] sm:$0xff]   ;;  %v970_v63 = vld [vmem:[%s1259_s1 + $0x1d8] sm:$0xff]  }
  0x10   :  { %841 = vmatpush3.bf16.msra.mxu0 %v938_v14  ;;  %v197_v49 = vrot.slane %v169_v46, %v1140_v41  ;;  %626 = vmatprep.mubr.bf16.mxu0 %v190_v47  ;;  %v200_v52 = vcombine.high %v190_v47, %v190_v47  ;;  %v964_v58 = vld [vmem:[%s1259_s1 + $0x188] sm:$0xff]   ;;  %v968_v62 = vld [vmem:[%s1259_s1 + $0x190] sm:$0xff]   ;;  %v971_v0 = vld [vmem:[%s1259_s1 + $0x118] sm:$0xff]  }
  0x11   :  { %863 = vmatpush3.bf16.msra.mxu1 %v939_v15  ;;  %842 = vmatprep.subr.bf16.mxu0 %v940_v16  ;;  %v973_v1 = vld [vmem:[%s1259_s1 + $0x160] sm:$0xff]   ;;  %v972_v2 = vld [vmem:[%s1259_s1 + $0x198] sm:$0xff]   ;;  %v977_v5 = vld [vmem:[%s1259_s1 + $0x168] sm:$0xff]  }
  0x12   :  { %864 = vmatprep.subr.bf16.mxu1 %v941_v17  ;;  %v201_v55 = vcombine.high %v197_v49, %v197_v49  ;;  %666 = vmatprep.mubr.bf16.mxu1 %v200_v52  ;;  %v974_v3 = vld [vmem:[%s1259_s1 + $0x1e0] sm:$0xff]   ;;  %v978_v7 = vld [vmem:[%s1259_s1 + $0x1e8] sm:$0xff]   ;;  %v981_v9 = vld [vmem:[%s1259_s1 + $0x170] sm:$0xff]  }
  0x13   :  { %v975_v4 = vld [vmem:[%s1259_s1 + $0x120] sm:$0xff]   ;;  %v979_v8 = vld [vmem:[%s1259_s1 + $0x128] sm:$0xff]  }
  0x14   :  { %843 = vmatpush3.bf16.msra.mxu0 %v942_v18  ;;  %v976_v6 = vld [vmem:[%s1259_s1 + $0x1a0] sm:$0xff]  }
  0x15   :  { %865 = vmatpush3.bf16.msra.mxu1 %v943_v19  ;;  %844 = vmatprep.subr.bf16.mxu0 %v944_v20 }
  0x16   :  { %866 = vmatprep.subr.bf16.mxu1 %v945_v21 }
  0x18   :  { %845 = vmatpush3.bf16.msra.mxu0 %v946_v22 }
  0x19   :  { %867 = vmatpush3.bf16.msra.mxu1 %v947_v23  ;;  %846 = vmatprep.subr.bf16.mxu0 %v948_v24 }
  0x1a   :  { %868 = vmatprep.subr.bf16.mxu1 %v949_v25 }
  0x1c   :  { %847 = vmatpush3.bf16.msra.mxu0 %v950_v26 }
  0x1d   :  { %869 = vmatpush3.bf16.msra.mxu1 %v951_v27  ;;  %848 = vmatprep.subr.bf16.mxu0 %v952_v29 }
  0x1e   :  { %870 = vmatprep.subr.bf16.mxu1 %v953_v30 }
  0x20   :  { %849 = vmatpush3.bf16.msra.mxu0 %v954_v31 }
  0x21   :  { %871 = vmatpush3.bf16.msra.mxu1 %v955_v32  ;;  %878 = vmatprep.subr.bf16.mxu0 %v957_v35 }
  0x22   :  { %900 = vmatprep.subr.bf16.mxu1 %v958_v38 }
  0x23   :  { %627 = vmatmul.mubr.bf16.vlgmr.msra.gmra.mrb[0].mxu0 %v176_v45 }
  0x24   :  { %879 = vmatpush3.bf16.msra.mxu0 %v959_v48  ;;  %667 = vmatmul.mubr.bf16.vlgmr.msra.gmra.mrb[0].mxu1 %v198_v50 }
  0x25   :  { %880 = vmatprep.subr.bf16.mxu0 %v961_v51  ;;  %901 = vmatpush3.bf16.msra.mxu1 %v960_v53 }
  0x26   :  { %706 = vmatprep.mubr.bf16.mxu0 %v197_v49  ;;  %902 = vmatprep.subr.bf16.mxu1 %v962_v54 }
  0x27   :  { %746 = vmatprep.mubr.bf16.mxu1 %v201_v55 }
  0x28   :  { %881 = vmatpush3.bf16.msra.mxu0 %v963_v56 }
  0x29   :  { %882 = vmatprep.subr.bf16.mxu0 %v965_v57  ;;  %903 = vmatpush3.bf16.msra.mxu1 %v964_v58 }
  0x2a   :  { %904 = vmatprep.subr.bf16.mxu1 %v966_v59 }
  0x2c   :  { %883 = vmatpush3.bf16.msra.mxu0 %v967_v60 }
  0x2d   :  { %884 = vmatprep.subr.bf16.mxu0 %v969_v61  ;;  %905 = vmatpush3.bf16.msra.mxu1 %v968_v62 }
  0x2e   :  { %906 = vmatprep.subr.bf16.mxu1 %v970_v63 }
  0x30   :  { %885 = vmatpush3.bf16.msra.mxu0 %v971_v0 }
  0x31   :  { %886 = vmatprep.subr.bf16.mxu0 %v973_v1  ;;  %907 = vmatpush3.bf16.msra.mxu1 %v972_v2 }
  0x32   :  { %908 = vmatprep.subr.bf16.mxu1 %v974_v3 }
  0x34   :  { %887 = vmatpush3.bf16.msra.mxu0 %v975_v4 }
  0x35   :  { %888 = vmatprep.subr.bf16.mxu0 %v977_v5 }
  0x36   :  { %8 = vsyncpa [#allocation3], 0  ;;  %909 = vmatpush3.bf16.msra.mxu1 %v976_v6  ;;  %v980_v10 = vld [vmem:[%s1259_s1 + $0x1a8] sm:$0xff]   ;;  %v982_v11 = vld [vmem:[%s1259_s1 + $0x1f0] sm:$0xff]   ;;  %v183_v17 = vrot.slane %v1144_v43, %v1140_v41 }
  0x37   :  { %910 = vmatprep.subr.bf16.mxu1 %v978_v7  ;;  %v983_v12 = vld [vmem:[%s1259_s1 + $0x130] sm:$0xff]   ;;  %v985_v13 = vld [vmem:[%s1259_s1 + $0x178] sm:$0xff]   ;;  %v769_v21 = vld [vmem:[%s1260_s2] ss:$0 sm:$0xff] }
  0x38   :  { %889 = vmatpush3.bf16.msra.mxu0 %v979_v8  ;;  %v984_v14 = vld [vmem:[%s1259_s1 + $0x1b0] sm:$0xff]   ;;  %v986_v15 = vld [vmem:[%s1259_s1 + $0x1f8] sm:$0xff]   ;;  %v199_v19 = vcombine.high %v183_v17, %v183_v17 }
  0x39   :  { %890 = vmatprep.subr.bf16.mxu0 %v981_v9  ;;  %v987_v16 = vld [vmem:[%s1259_s1 + $0x138] sm:$0xff]  }
  0x3a   :  { %911 = vmatpush3.bf16.msra.mxu1 %v980_v10  ;;  %v988_v18 = vld [vmem:[%s1259_s1 + $0x1b8] sm:$0xff]   ;;  %s1014_s1 = smov [#allocation2]  }
  0x3b   :  { %912 = vmatprep.subr.bf16.mxu1 %v982_v11  ;;  %s761_s2 = sshll.u32 %s1014_s1, 4  ;;  %s762_s2 = int_to_ptr.vmem [resolvable:$true] %s761_s2 }
  0x3c   :  { %891 = vmatpush3.bf16.msra.mxu0 %v983_v12  ;;  %s989_s6 = scalar_lea.vmem %s762_s2, 32  ;;  %p994_p1 = scmp.lt.s32.totalorder %s762_s2, %s762_s2 }
  0x3d   :  { %892 = vmatprep.subr.bf16.mxu0 %v985_v13  ;;  %p990_p0 = scmp.ne.s32.totalorder %s762_s2, %s989_s6  ;;  %p995_p2 = scmp.lt.s32.totalorder %s989_s6, %s989_s6 }
  0x3e   :  { %913 = vmatpush3.bf16.msra.mxu1 %v984_v14 }
  0x3f   :  { %914 = vmatprep.subr.bf16.mxu1 %v986_v15  ;;  %p996_p3 = por %p995_p2, %p994_p1 }
  0x40   :  { %893 = vmatpush3.bf16.msra.mxu0 %v987_v16 }
  0x41   :  { %p997_p4 = pnand %p996_p3, %p990_p0 }
  0x42   :  { %915 = vmatpush3.bf16.msra.mxu1 %v988_v18 }
  0x43   :  { %707 = vmatmul.mubr.bf16.vlgmr.msra.gmra.mrb[4].mxu0 %v183_v17 }
  0x45   :  { %747 = vmatmul.mubr.bf16.vlgmr.msra.gmra.mrb[4].mxu1 %v199_v19 }
  0xf6   :  { %v850_v20 = vpop.f32.mrb[0].mxu0 }
  0xf7   :  { %v851_v22 = vpop.f32.mrb[1].mxu0  ;;  %v872_v23 = vpop.f32.mrb[0].mxu1 }
  0xf8   :  { %v852_v24 = vadd.f32 %v851_v22, %v850_v20  ;;  %v853_v25 = vpop.f32.mrb[2].mxu0  ;;  %v873_v26 = vpop.f32.mrb[1].mxu1 }
  0xf9   :  { %v854_v27 = vpop.f32.mrb[3].mxu0  ;;  %v874_v29 = vadd.f32 %v873_v26, %v872_v23  ;;  %v875_v30 = vpop.f32.mrb[2].mxu1 }
  0xfa   :  { %v629_v28 = vadd.f32 %v852_v24, %v769_v21  ;;  %v876_v31 = vpop.f32.mrb[3].mxu1 }
  0xfc   :  { %v669_v32 = vadd.f32 %v874_v29, %v629_v28 }
 0x116   :  { %v894_v33 = vpop.f32.mrb[4].mxu0 }
 0x117   :  { %v895_v34 = vpop.f32.mrb[5].mxu0 }
 0x118   :  { %v916_v35 = vpop.f32.mrb[4].mxu1  ;;  %v896_v36 = vadd.f32 %v895_v34, %v894_v33  ;;  %v897_v37 = vpop.f32.mrb[6].mxu0 }
 0x119   :  { %v917_v38 = vpop.f32.mrb[5].mxu1  ;;  %v898_v39 = vpop.f32.mrb[7].mxu0 }
 0x11a   :  { %v709_v40 = vadd.f32 %v896_v36, %v669_v32  ;;  %v918_v41 = vadd.f32 %v917_v38, %v916_v35  ;;  %v919_v42 = vpop.f32.mrb[6].mxu1 }
 0x11b   :  { %v920_v43 = vpop.f32.mrb[7].mxu1 }
 0x11c   :  { %v749_v44 = vadd.f32 %v918_v41, %v709_v40 }
 0x11e   :  { %754 = vst [vmem:[#allocation2] sm:$0x3] %v749_v44 }
 0x11f   :  { %1000 = shalt.err (!%p997_p4)
}
 0x120   :  { %s1001_s9 = scalar_lea.hbm %s1261_s3, 32 }
 0x121   :  { %p1002_p5 = scmp.ne.s32.totalorder %s1261_s3, %s1001_s9  ;;  %p1005_p6 = scmp.lt.u32.totalorder %s1001_s9, %s1261_s3 }
 0x123   :  { %p1007_p7 = pnand %p1005_p6, %p1002_p5 }
 0x125   :  { %1010 = shalt.err (!%p1007_p7)
}
 0x126   :  { %764 = dma.vmem_to_hbm [thread:$0]  %s762_s2, 32, %s1261_s3, [#allocation3]  }
 0x127   :  { %1011 = dma.done.wait [#allocation3], 32  }
 0x128   :  { %1012 = vsyncadd [#allocation3], 4294967264 }
 0x129   :  { %768 = vsyncpa [#allocation3], 1 }

</bundles_post_ra>
